<compile_context>
chip_gen: v7x
topology: tpu7x:2x2x1
jax: 0.10.0
libtpu: 0.0.40
codegen_flags: <defaults>
</compile_context>

<pallas_src>
import math
import functools

import jax
import jax.numpy as jnp
from jax.experimental import pallas as pl
from jax.experimental.pallas import tpu as pltpu


def _layer_norm(x, gamma, beta, eps=1e-5):
    mean = jnp.mean(x, axis=-1, keepdims=True)
    var = jnp.mean((x - mean) ** 2, axis=-1, keepdims=True)
    return (x - mean) * jax.lax.rsqrt(var + eps) * gamma + beta


def encoder_layer_kernel(
    x_ref, mask_ref,
    wqkv_ref, bqkv_ref, wo_ref, bo_ref,
    w1_ref, b1_ref, w2_ref, b2_ref,
    g1_ref, be1_ref, g2_ref, be2_ref,
    out_ref,
    q_s, k_s, v_s, ctx_s,
    *, num_heads, d_k, q_tile, compute_dtype, approx_recip,
):
    D = num_heads * d_k
    S = x_ref.shape[1]
    num_q_tiles = S // q_tile
    qi = pl.program_id(1)

    # ---- fused QKV projection: one (S, D) @ (D, 3D) matmul, once per batch element ----
    def _project_qkv():
        x_c = x_ref[0].astype(compute_dtype)                               # (S, D)
        qkv = jnp.dot(x_c, wqkv_ref[...],
                      preferred_element_type=jnp.float32) + bqkv_ref[...]  # (S, 3D) f32
        qkv = qkv.astype(compute_dtype)
        for h in range(num_heads):                                         # head-major cache
            lo = h * d_k
            q_s[h] = qkv[:, lo:lo + d_k]
            k_s[h] = qkv[:, D + lo:D + lo + d_k]
            v_s[h] = qkv[:, 2 * D + lo:2 * D + lo + d_k]

    if num_q_tiles == 1:
        _project_qkv()
    else:
        pl.when(qi == 0)(_project_qkv)

    # ---- rows of this query tile ----
    if num_q_tiles == 1:
        x_tile = x_ref[0]                                                  # (Tq, D) f32
        q3 = q_s[...]                                                      # (H, Tq, d_k)
    else:
        row0 = pl.multiple_of(qi * q_tile, q_tile)
        x_tile = x_ref[0, pl.ds(row0, q_tile), :]
        q3 = q_s[:, pl.ds(row0, q_tile), :]

    # ---- additive mask bias, computed once (shared by all heads) ----
    bias = jnp.where(mask_ref[0, 0] == 0.0, -1e9, 0.0).reshape(1, 1, S)    # f32

    # ---- multi-head attention, batched over heads (no per-head transposes / concat) ----
    scale = 1.0 / math.sqrt(d_k)
    scores = jnp.einsum("hqd,hkd->hqk", q3, k_s[...],
                        preferred_element_type=jnp.float32) * scale + bias  # (H, Tq, S)
    m = jnp.max(scores, axis=-1, keepdims=True)
    p = jnp.exp(scores - m)
    denom = jnp.sum(p, axis=-1, keepdims=True)
    # NOTE: fully-masked rows degrade to a (near-)uniform softmax rather than NaN.
    attn = (p * pl.reciprocal(denom, approx=approx_recip)).astype(compute_dtype)
    ctx3 = jnp.einsum("hqk,hkd->hqd", attn, v_s[...],
                      preferred_element_type=jnp.float32).astype(compute_dtype)  # (H,Tq,dk)
    for h in range(num_heads):                                             # scatter to slab
        ctx_s[:, h * d_k:(h + 1) * d_k] = ctx3[h]

    attn_out = jnp.dot(ctx_s[...], wo_ref[...],
                       preferred_element_type=jnp.float32) + bo_ref[...]   # (Tq, D) f32

    # residual + LayerNorm1 (dropout1 is identity)
    src1 = _layer_norm(x_tile + attn_out, g1_ref[...], be1_ref[...])

    # ---- feed-forward (dropout inside FF is identity) ----
    h1 = jnp.dot(src1.astype(compute_dtype), w1_ref[...],
                 preferred_element_type=jnp.float32) + b1_ref[...]
    h1 = jnp.maximum(h1, 0.0)
    ff = jnp.dot(h1.astype(compute_dtype), w2_ref[...],
                 preferred_element_type=jnp.float32) + b2_ref[...]

    # residual + LayerNorm2 (dropout2 is identity)
    out_ref[0] = _layer_norm(src1 + ff, g2_ref[...], be2_ref[...])


def encoder_layer(src, src_mask, params, *, num_heads,
                  q_tile=None, compute_dtype=jnp.bfloat16):
    B, S, D = src.shape
    assert D % num_heads == 0
    d_k = D // num_heads

    if q_tile is None:
        q_tile = next((t for t in (256, 128) if S % t == 0), S)
    assert S % q_tile == 0
    num_q_tiles = S // q_tile

    # Host-side prep: fuse Q/K/V into one (D, 3D) weight and pre-cast matmul weights to the
    # compute dtype (halves weight VMEM/HBM traffic on the bf16 path).  Biases, LayerNorm
    # gamma/beta stay f32.
    wqkv = jnp.concatenate(
        [params["wq"], params["wk"], params["wv"]], axis=1).astype(compute_dtype)
    bqkv = jnp.concatenate([params["bq"], params["bk"], params["bv"]], axis=1)
    weight_args = [
        wqkv, bqkv,
        params["wo"].astype(compute_dtype), params["bo"],
        params["w1"].astype(compute_dtype), params["b1"],
        params["w2"].astype(compute_dtype), params["b2"],
        params["g1"], params["be1"], params["g2"], params["be2"],
    ]

    kernel = functools.partial(
        encoder_layer_kernel, num_heads=num_heads, d_k=d_k, q_tile=q_tile,
        compute_dtype=compute_dtype, approx_recip=(compute_dtype != jnp.float32))

    def rep(shape):
        # Grid-invariant weight/bias: same block index every step -> Pallas skips re-DMA.
        return pl.BlockSpec(shape, lambda b, qi: (0,) * len(shape))

    in_specs = [
        pl.BlockSpec((1, S, D), lambda b, qi: (b, 0, 0)),         # src: full seq per batch
        pl.BlockSpec((1, 1, 1, S), lambda b, qi: (b, 0, 0, 0)),   # mask
    ] + [rep(a.shape) for a in weight_args]

    out_spec = pl.BlockSpec((1, q_tile, D), lambda b, qi: (b, qi, 0))

    scratch_shapes = [
        pltpu.VMEM((num_heads, S, d_k), compute_dtype),   # Q cache (head-major, full seq)
        pltpu.VMEM((num_heads, S, d_k), compute_dtype),   # K cache
        pltpu.VMEM((num_heads, S, d_k), compute_dtype),   # V cache
        pltpu.VMEM((q_tile, D), compute_dtype),           # attention context slab
    ]

    return pl.pallas_call(
        kernel,
        out_shape=jax.ShapeDtypeStruct((B, S, D), jnp.float32),
        grid_spec=pltpu.PrefetchScalarGridSpec(
            num_scalar_prefetch=0,
            grid=(B, num_q_tiles),
            in_specs=in_specs,
            out_specs=out_spec,
            scratch_shapes=scratch_shapes,
        ),
        compiler_params=pltpu.CompilerParams(
            dimension_semantics=("parallel", "arbitrary"),  # batch across TCs (v7x)
            vmem_limit_bytes=64 * 1024 * 1024,
        ),
    )(src, src_mask, *weight_args)


# ---------------------------------------------------------------------------
# Pure-JAX reference (mirrors the PyTorch forward, dropout = identity)
# ---------------------------------------------------------------------------
def encoder_layer_ref(src, src_mask, params, *, num_heads):
    B, S, D = src.shape
    d_k = D // num_heads

    def lin(x, w, b):
        return x @ w + b[0]

    q = lin(src, params["wq"], params["bq"]).reshape(B, S, num_heads, d_k).transpose(0, 2, 1, 3)
    k = lin(src, params["wk"], params["bk"]).reshape(B, S, num_heads, d_k).transpose(0, 2, 1, 3)
    v = lin(src, params["wv"], params["bv"]).reshape(B, S, num_heads, d_k).transpose(0, 2, 1, 3)
    scores = jnp.einsum("bhqd,bhkd->bhqk", q, k) / math.sqrt(d_k)
    scores = jnp.where(src_mask == 0, -1e9, scores)
    attn = jax.nn.softmax(scores, axis=-1)
    o = jnp.einsum("bhqk,bhkd->bhqd", attn, v).transpose(0, 2, 1, 3).reshape(B, S, D)
    attn_out = lin(o, params["wo"], params["bo"])

    def ln(x, g, b, eps=1e-5):
        m = x.mean(-1, keepdims=True)
        var = ((x - m) ** 2).mean(-1, keepdims=True)
        return (x - m) / jnp.sqrt(var + eps) * g[0] + b[0]

    src1 = ln(src + attn_out, params["g1"], params["be1"])
    ff = lin(jnp.maximum(lin(src1, params["w1"], params["b1"]), 0.0), params["w2"], params["b2"])
    return ln(src1 + ff, params["g2"], params["be2"])


if __name__ == "__main__":
    B, S, D, H, D_FF = 2, 8, 32, 4, 64

    key = jax.random.PRNGKey(0)
    keys = jax.random.split(key, 16)

    def w(k, shape, scale=0.1):
        return jax.random.normal(k, shape, dtype=jnp.float32) * scale

    params = {
        "wq": w(keys[0], (D, D)), "bq": w(keys[1], (1, D)),
        "wk": w(keys[2], (D, D)), "bk": w(keys[3], (1, D)),
        "wv": w(keys[4], (D, D)), "bv": w(keys[5], (1, D)),
        "wo": w(keys[6], (D, D)), "bo": w(keys[7], (1, D)),
        "w1": w(keys[8], (D, D_FF)), "b1": w(keys[9], (1, D_FF)),
        "w2": w(keys[10], (D_FF, D)), "b2": w(keys[11], (1, D)),
        "g1": jnp.ones((1, D), jnp.float32), "be1": jnp.zeros((1, D), jnp.float32),
        "g2": jnp.ones((1, D), jnp.float32), "be2": jnp.zeros((1, D), jnp.float32),
    }

    src = jax.random.normal(keys[12], (B, S, D), dtype=jnp.float32)
    # mask: [B, 1, 1, S]; zero out last 2 key positions for batch 1
    mask = jnp.ones((B, 1, 1, S), dtype=jnp.float32)
    mask = mask.at[1, :, :, -2:].set(0.0)

    ref = encoder_layer_ref(src, mask, params, num_heads=H)

    # Exact-math path (f32 matmuls, exact reciprocal): tight check vs reference.
    out_f32 = jax.block_until_ready(
        encoder_layer(src, mask, params, num_heads=H, compute_dtype=jnp.float32))
    if not jnp.allclose(out_f32, ref, atol=1e-4, rtol=1e-4):
        raise AssertionError("f32 Pallas kernel output mismatch vs JAX reference")

    # Fast path (bf16 MXU inputs, f32 accumulation, approx softmax reciprocal):
    # looser tolerance due to bf16 rounding of matmul inputs.
    out = jax.block_until_ready(encoder_layer(src, mask, params, num_heads=H))
    if not jnp.allclose(out, ref, atol=5e-2, rtol=5e-2):
        raise AssertionError("bf16 Pallas kernel output mismatch vs JAX reference")

    print("KERNEL_OK")
</pallas_src>

<mosaic_0001>
module attributes {stable_mosaic.version = 11 : i64} {
  func.func @encoder_layer_kernel(%arg0: i32, %arg1: i32, %arg2: memref<1x8x32xf32, #tpu.memory_space<vmem>>, %arg3: memref<1x1x1x8xf32, #tpu.memory_space<vmem>>, %arg4: memref<32x96xf32, #tpu.memory_space<vmem>>, %arg5: memref<1x96xf32, #tpu.memory_space<vmem>>, %arg6: memref<32x32xf32, #tpu.memory_space<vmem>>, %arg7: memref<1x32xf32, #tpu.memory_space<vmem>>, %arg8: memref<32x64xf32, #tpu.memory_space<vmem>>, %arg9: memref<1x64xf32, #tpu.memory_space<vmem>>, %arg10: memref<64x32xf32, #tpu.memory_space<vmem>>, %arg11: memref<1x32xf32, #tpu.memory_space<vmem>>, %arg12: memref<1x32xf32, #tpu.memory_space<vmem>>, %arg13: memref<1x32xf32, #tpu.memory_space<vmem>>, %arg14: memref<1x32xf32, #tpu.memory_space<vmem>>, %arg15: memref<1x32xf32, #tpu.memory_space<vmem>>, %arg16: memref<1x8x32xf32, #tpu.memory_space<vmem>>, %arg17: memref<4x8x8xf32, #tpu.memory_space<vmem>>, %arg18: memref<4x8x8xf32, #tpu.memory_space<vmem>>, %arg19: memref<4x8x8xf32, #tpu.memory_space<vmem>>, %arg20: memref<8x32xf32, #tpu.memory_space<vmem>>) attributes {dimension_semantics = [#tpu.dimension_semantics<parallel>, #tpu.dimension_semantics<arbitrary>], iteration_bounds = array<i64: 2, 1>, scalar_prefetch = 0 : i64, scratch_operands = 4 : i64, tpu.core_type = #tpu.core_type<tc>, window_params = [{transform_indices = @transform_0, window_bounds = array<i64: 1, 8, 32>}, {transform_indices = @transform_1, window_bounds = array<i64: 1, 1, 1, 8>}, {pipeline_mode = #tpu.pipeline_mode<synchronous>, transform_indices = @transform_2, window_bounds = array<i64: 32, 96>}, {pipeline_mode = #tpu.pipeline_mode<synchronous>, transform_indices = @transform_3, window_bounds = array<i64: 1, 96>}, {pipeline_mode = #tpu.pipeline_mode<synchronous>, transform_indices = @transform_4, window_bounds = array<i64: 32, 32>}, {pipeline_mode = #tpu.pipeline_mode<synchronous>, transform_indices = @transform_5, window_bounds = array<i64: 1, 32>}, {pipeline_mode = #tpu.pipeline_mode<synchronous>, transform_indices = @transform_6, window_bounds = array<i64: 32, 64>}, {pipeline_mode = #tpu.pipeline_mode<synchronous>, transform_indices = @transform_7, window_bounds = array<i64: 1, 64>}, {pipeline_mode = #tpu.pipeline_mode<synchronous>, transform_indices = @transform_8, window_bounds = array<i64: 64, 32>}, {pipeline_mode = #tpu.pipeline_mode<synchronous>, transform_indices = @transform_9, window_bounds = array<i64: 1, 32>}, {pipeline_mode = #tpu.pipeline_mode<synchronous>, transform_indices = @transform_10, window_bounds = array<i64: 1, 32>}, {pipeline_mode = #tpu.pipeline_mode<synchronous>, transform_indices = @transform_11, window_bounds = array<i64: 1, 32>}, {pipeline_mode = #tpu.pipeline_mode<synchronous>, transform_indices = @transform_12, window_bounds = array<i64: 1, 32>}, {pipeline_mode = #tpu.pipeline_mode<synchronous>, transform_indices = @transform_13, window_bounds = array<i64: 1, 32>}, {transform_indices = @transform_14, window_bounds = array<i64: 1, 8, 32>}]} {
    %c0 = arith.constant 0 : index
    %c0_0 = arith.constant 0 : index
    %c0_1 = arith.constant 0 : index
    %0 = vector.load %arg2[%c0, %c0_0, %c0_1] : memref<1x8x32xf32, #tpu.memory_space<vmem>>, vector<1x8x32xf32>
    %1 = vector.shape_cast %0 : vector<1x8x32xf32> to vector<8x32xf32>
    %c0_2 = arith.constant 0 : index
    %c0_3 = arith.constant 0 : index
    %2 = vector.load %arg4[%c0_2, %c0_3] : memref<32x96xf32, #tpu.memory_space<vmem>>, vector<32x96xf32>
    %cst = arith.constant dense<0.000000e+00> : vector<8x96xf32>
    %3 = tpu.matmul %1, %2, %cst {dimension_numbers = #tpu.dot_dimension_numbers<[1], [0], [0], [1], [0, 0, 1, 1], [], []>} : vector<8x32xf32>, vector<32x96xf32>, vector<8x96xf32> -> vector<8x96xf32>
    %c0_4 = arith.constant 0 : index
    %c0_5 = arith.constant 0 : index
    %4 = vector.load %arg5[%c0_4, %c0_5] : memref<1x96xf32, #tpu.memory_space<vmem>>, vector<1x96xf32>
    %5 = vector.broadcast %4 : vector<1x96xf32> to vector<8x96xf32>
    %6 = arith.addf %3, %5 : vector<8x96xf32>
    %7 = vector.extract_strided_slice %6 {offsets = [0, 0], sizes = [8, 8], strides = [1, 1]} : vector<8x96xf32> to vector<8x8xf32>
    %c0_6 = arith.constant 0 : index
    %c0_7 = arith.constant 0 : index
    %c0_8 = arith.constant 0 : index
    %8 = vector.load %arg17[%c0_6, %c0_7, %c0_8] : memref<4x8x8xf32, #tpu.memory_space<vmem>>, vector<1x8x8xf32>
    %9 = vector.shape_cast %8 : vector<1x8x8xf32> to vector<8x8xf32>
    %10 = vector.shape_cast %7 : vector<8x8xf32> to vector<1x8x8xf32>
    tpu.vector_store %arg17[%c0_6, %c0_7, %c0_8], %10 {strides = array<i32>} : memref<4x8x8xf32, #tpu.memory_space<vmem>>, vector<1x8x8xf32>,
    %11 = vector.extract_strided_slice %6 {offsets = [0, 32], sizes = [8, 8], strides = [1, 1]} : vector<8x96xf32> to vector<8x8xf32>
    %c0_9 = arith.constant 0 : index
    %c0_10 = arith.constant 0 : index
    %c0_11 = arith.constant 0 : index
    %12 = vector.load %arg18[%c0_9, %c0_10, %c0_11] : memref<4x8x8xf32, #tpu.memory_space<vmem>>, vector<1x8x8xf32>
    %13 = vector.shape_cast %12 : vector<1x8x8xf32> to vector<8x8xf32>
    %14 = vector.shape_cast %11 : vector<8x8xf32> to vector<1x8x8xf32>
    tpu.vector_store %arg18[%c0_9, %c0_10, %c0_11], %14 {strides = array<i32>} : memref<4x8x8xf32, #tpu.memory_space<vmem>>, vector<1x8x8xf32>,
    %15 = vector.extract_strided_slice %6 {offsets = [0, 64], sizes = [8, 8], strides = [1, 1]} : vector<8x96xf32> to vector<8x8xf32>
    %c0_12 = arith.constant 0 : index
    %c0_13 = arith.constant 0 : index
    %c0_14 = arith.constant 0 : index
    %16 = vector.load %arg19[%c0_12, %c0_13, %c0_14] : memref<4x8x8xf32, #tpu.memory_space<vmem>>, vector<1x8x8xf32>
    %17 = vector.shape_cast %16 : vector<1x8x8xf32> to vector<8x8xf32>
    %18 = vector.shape_cast %15 : vector<8x8xf32> to vector<1x8x8xf32>
    tpu.vector_store %arg19[%c0_12, %c0_13, %c0_14], %18 {strides = array<i32>} : memref<4x8x8xf32, #tpu.memory_space<vmem>>, vector<1x8x8xf32>,
    %19 = vector.extract_strided_slice %6 {offsets = [0, 8], sizes = [8, 8], strides = [1, 1]} : vector<8x96xf32> to vector<8x8xf32>
    %c1 = arith.constant 1 : index
    %c0_15 = arith.constant 0 : index
    %c0_16 = arith.constant 0 : index
    %20 = vector.load %arg17[%c1, %c0_15, %c0_16] : memref<4x8x8xf32, #tpu.memory_space<vmem>>, vector<1x8x8xf32>
    %21 = vector.shape_cast %20 : vector<1x8x8xf32> to vector<8x8xf32>
    %22 = vector.shape_cast %19 : vector<8x8xf32> to vector<1x8x8xf32>
    tpu.vector_store %arg17[%c1, %c0_15, %c0_16], %22 {strides = array<i32>} : memref<4x8x8xf32, #tpu.memory_space<vmem>>, vector<1x8x8xf32>,
    %23 = vector.extract_strided_slice %6 {offsets = [0, 40], sizes = [8, 8], strides = [1, 1]} : vector<8x96xf32> to vector<8x8xf32>
    %c1_17 = arith.constant 1 : index
    %c0_18 = arith.constant 0 : index
    %c0_19 = arith.constant 0 : index
    %24 = vector.load %arg18[%c1_17, %c0_18, %c0_19] : memref<4x8x8xf32, #tpu.memory_space<vmem>>, vector<1x8x8xf32>
    %25 = vector.shape_cast %24 : vector<1x8x8xf32> to vector<8x8xf32>
    %26 = vector.shape_cast %23 : vector<8x8xf32> to vector<1x8x8xf32>
    tpu.vector_store %arg18[%c1_17, %c0_18, %c0_19], %26 {strides = array<i32>} : memref<4x8x8xf32, #tpu.memory_space<vmem>>, vector<1x8x8xf32>,
    %27 = vector.extract_strided_slice %6 {offsets = [0, 72], sizes = [8, 8], strides = [1, 1]} : vector<8x96xf32> to vector<8x8xf32>
    %c1_20 = arith.constant 1 : index
    %c0_21 = arith.constant 0 : index
    %c0_22 = arith.constant 0 : index
    %28 = vector.load %arg19[%c1_20, %c0_21, %c0_22] : memref<4x8x8xf32, #tpu.memory_space<vmem>>, vector<1x8x8xf32>
    %29 = vector.shape_cast %28 : vector<1x8x8xf32> to vector<8x8xf32>
    %30 = vector.shape_cast %27 : vector<8x8xf32> to vector<1x8x8xf32>
    tpu.vector_store %arg19[%c1_20, %c0_21, %c0_22], %30 {strides = array<i32>} : memref<4x8x8xf32, #tpu.memory_space<vmem>>, vector<1x8x8xf32>,
    %31 = vector.extract_strided_slice %6 {offsets = [0, 16], sizes = [8, 8], strides = [1, 1]} : vector<8x96xf32> to vector<8x8xf32>
    %c2 = arith.constant 2 : index
    %c0_23 = arith.constant 0 : index
    %c0_24 = arith.constant 0 : index
    %32 = vector.load %arg17[%c2, %c0_23, %c0_24] : memref<4x8x8xf32, #tpu.memory_space<vmem>>, vector<1x8x8xf32>
    %33 = vector.shape_cast %32 : vector<1x8x8xf32> to vector<8x8xf32>
    %34 = vector.shape_cast %31 : vector<8x8xf32> to vector<1x8x8xf32>
    tpu.vector_store %arg17[%c2, %c0_23, %c0_24], %34 {strides = array<i32>} : memref<4x8x8xf32, #tpu.memory_space<vmem>>, vector<1x8x8xf32>,
    %35 = vector.extract_strided_slice %6 {offsets = [0, 48], sizes = [8, 8], strides = [1, 1]} : vector<8x96xf32> to vector<8x8xf32>
    %c2_25 = arith.constant 2 : index
    %c0_26 = arith.constant 0 : index
    %c0_27 = arith.constant 0 : index
    %36 = vector.load %arg18[%c2_25, %c0_26, %c0_27] : memref<4x8x8xf32, #tpu.memory_space<vmem>>, vector<1x8x8xf32>
    %37 = vector.shape_cast %36 : vector<1x8x8xf32> to vector<8x8xf32>
    %38 = vector.shape_cast %35 : vector<8x8xf32> to vector<1x8x8xf32>
    tpu.vector_store %arg18[%c2_25, %c0_26, %c0_27], %38 {strides = array<i32>} : memref<4x8x8xf32, #tpu.memory_space<vmem>>, vector<1x8x8xf32>,
    %39 = vector.extract_strided_slice %6 {offsets = [0, 80], sizes = [8, 8], strides = [1, 1]} : vector<8x96xf32> to vector<8x8xf32>
    %c2_28 = arith.constant 2 : index
    %c0_29 = arith.constant 0 : index
    %c0_30 = arith.constant 0 : index
    %40 = vector.load %arg19[%c2_28, %c0_29, %c0_30] : memref<4x8x8xf32, #tpu.memory_space<vmem>>, vector<1x8x8xf32>
    %41 = vector.shape_cast %40 : vector<1x8x8xf32> to vector<8x8xf32>
    %42 = vector.shape_cast %39 : vector<8x8xf32> to vector<1x8x8xf32>
    tpu.vector_store %arg19[%c2_28, %c0_29, %c0_30], %42 {strides = array<i32>} : memref<4x8x8xf32, #tpu.memory_space<vmem>>, vector<1x8x8xf32>,
    %43 = vector.extract_strided_slice %6 {offsets = [0, 24], sizes = [8, 8], strides = [1, 1]} : vector<8x96xf32> to vector<8x8xf32>
    %c3 = arith.constant 3 : index
    %c0_31 = arith.constant 0 : index
    %c0_32 = arith.constant 0 : index
    %44 = vector.load %arg17[%c3, %c0_31, %c0_32] : memref<4x8x8xf32, #tpu.memory_space<vmem>>, vector<1x8x8xf32>
    %45 = vector.shape_cast %44 : vector<1x8x8xf32> to vector<8x8xf32>
    %46 = vector.shape_cast %43 : vector<8x8xf32> to vector<1x8x8xf32>
    tpu.vector_store %arg17[%c3, %c0_31, %c0_32], %46 {strides = array<i32>} : memref<4x8x8xf32, #tpu.memory_space<vmem>>, vector<1x8x8xf32>,
    %47 = vector.extract_strided_slice %6 {offsets = [0, 56], sizes = [8, 8], strides = [1, 1]} : vector<8x96xf32> to vector<8x8xf32>
    %c3_33 = arith.constant 3 : index
    %c0_34 = arith.constant 0 : index
    %c0_35 = arith.constant 0 : index
    %48 = vector.load %arg18[%c3_33, %c0_34, %c0_35] : memref<4x8x8xf32, #tpu.memory_space<vmem>>, vector<1x8x8xf32>
    %49 = vector.shape_cast %48 : vector<1x8x8xf32> to vector<8x8xf32>
    %50 = vector.shape_cast %47 : vector<8x8xf32> to vector<1x8x8xf32>
    tpu.vector_store %arg18[%c3_33, %c0_34, %c0_35], %50 {strides = array<i32>} : memref<4x8x8xf32, #tpu.memory_space<vmem>>, vector<1x8x8xf32>,
    %51 = vector.extract_strided_slice %6 {offsets = [0, 88], sizes = [8, 8], strides = [1, 1]} : vector<8x96xf32> to vector<8x8xf32>
    %c3_36 = arith.constant 3 : index
    %c0_37 = arith.constant 0 : index
    %c0_38 = arith.constant 0 : index
    %52 = vector.load %arg19[%c3_36, %c0_37, %c0_38] : memref<4x8x8xf32, #tpu.memory_space<vmem>>, vector<1x8x8xf32>
    %53 = vector.shape_cast %52 : vector<1x8x8xf32> to vector<8x8xf32>
    %54 = vector.shape_cast %51 : vector<8x8xf32> to vector<1x8x8xf32>
    tpu.vector_store %arg19[%c3_36, %c0_37, %c0_38], %54 {strides = array<i32>} : memref<4x8x8xf32, #tpu.memory_space<vmem>>, vector<1x8x8xf32>,
    %c0_39 = arith.constant 0 : index
    %c0_40 = arith.constant 0 : index
    %c0_41 = arith.constant 0 : index
    %55 = vector.load %arg2[%c0_39, %c0_40, %c0_41] : memref<1x8x32xf32, #tpu.memory_space<vmem>>, vector<1x8x32xf32>
    %56 = vector.shape_cast %55 : vector<1x8x32xf32> to vector<8x32xf32>
    %c0_42 = arith.constant 0 : index
    %c0_43 = arith.constant 0 : index
    %c0_44 = arith.constant 0 : index
    %57 = vector.load %arg17[%c0_42, %c0_43, %c0_44] : memref<4x8x8xf32, #tpu.memory_space<vmem>>, vector<4x8x8xf32>
    %c0_45 = arith.constant 0 : index
    %c0_46 = arith.constant 0 : index
    %c0_47 = arith.constant 0 : index
    %c0_48 = arith.constant 0 : index
    %58 = vector.load %arg3[%c0_45, %c0_46, %c0_47, %c0_48] : memref<1x1x1x8xf32, #tpu.memory_space<vmem>>, vector<1x1x1x8xf32>
    %59 = vector.shape_cast %58 : vector<1x1x1x8xf32> to vector<1x8xf32>
    %cst_49 = arith.constant 0.000000e+00 : f32
    %60 = vector.broadcast %cst_49 : f32 to vector<1x8xf32>
    %61 = arith.cmpf oeq, %59, %60 : vector<1x8xf32>
    %cst_50 = arith.constant -1.000000e+09 : f32
    %cst_51 = arith.constant 0.000000e+00 : f32
    %62 = vector.broadcast %cst_50 : f32 to vector<1x8xf32>
    %63 = vector.broadcast %cst_51 : f32 to vector<1x8xf32>
    %64 = arith.select %61, %62, %63 : vector<1x8xi1>, vector<1x8xf32>
    %65 = vector.shape_cast %64 : vector<1x8xf32> to vector<1x1x8xf32>
    %c0_52 = arith.constant 0 : index
    %c0_53 = arith.constant 0 : index
    %c0_54 = arith.constant 0 : index
    %66 = vector.load %arg18[%c0_52, %c0_53, %c0_54] : memref<4x8x8xf32, #tpu.memory_space<vmem>>, vector<4x8x8xf32>
    "tpu.trace_start"() <{level = 10 : i32, message = "hqd,hkd->hqk"}> : () -> ()
    %cst_55 = arith.constant dense<0.000000e+00> : vector<4x8x8xf32>
    %67 = tpu.matmul %57, %66, %cst_55 {dimension_numbers = #tpu.dot_dimension_numbers<[2], [2], [1], [1], [0, 0, 0, 1, 1, 1], [0], [0]>} : vector<4x8x8xf32>, vector<4x8x8xf32>, vector<4x8x8xf32> -> vector<4x8x8xf32>
    "tpu.trace_stop"() : () -> ()
    %cst_56 = arith.constant 0.353553385 : f32
    %68 = vector.broadcast %cst_56 : f32 to vector<4x8x8xf32>
    %69 = arith.mulf %67, %68 : vector<4x8x8xf32>
    %70 = vector.broadcast %65 : vector<1x1x8xf32> to vector<4x8x8xf32>
    %71 = arith.addf %69, %70 : vector<4x8x8xf32>
    %cst_57 = arith.constant dense<0xFF800000> : vector<4x8xf32>
    %72 = vector.multi_reduction <maximumf>, %71, %cst_57 [2] : vector<4x8x8xf32> to vector<4x8xf32>
    %73 = vector.shape_cast %72 : vector<4x8xf32> to vector<4x8x1xf32>
    %74 = vector.broadcast %73 : vector<4x8x1xf32> to vector<4x8x8xf32>
    %75 = arith.subf %71, %74 : vector<4x8x8xf32>
    %76 = math.exp %75 : vector<4x8x8xf32>
    %cst_58 = arith.constant dense<0.000000e+00> : vector<4x8xf32>
    %77 = vector.multi_reduction <add>, %76, %cst_58 [2] : vector<4x8x8xf32> to vector<4x8xf32>
    %78 = vector.shape_cast %77 : vector<4x8xf32> to vector<4x8x1xf32>
    %79 = tpu.reciprocal %78 : vector<4x8x1xf32> -> vector<4x8x1xf32>
    %80 = vector.broadcast %79 : vector<4x8x1xf32> to vector<4x8x8xf32>
    %81 = arith.mulf %76, %80 : vector<4x8x8xf32>
    %c0_59 = arith.constant 0 : index
    %c0_60 = arith.constant 0 : index
    %c0_61 = arith.constant 0 : index
    %82 = vector.load %arg19[%c0_59, %c0_60, %c0_61] : memref<4x8x8xf32, #tpu.memory_space<vmem>>, vector<4x8x8xf32>
    "tpu.trace_start"() <{level = 10 : i32, message = "hqk,hkd->hqd"}> : () -> ()
    %cst_62 = arith.constant dense<0.000000e+00> : vector<4x8x8xf32>
    %83 = tpu.matmul %81, %82, %cst_62 {dimension_numbers = #tpu.dot_dimension_numbers<[2], [1], [1], [2], [0, 0, 0, 1, 1, 2], [0], [0]>} : vector<4x8x8xf32>, vector<4x8x8xf32>, vector<4x8x8xf32> -> vector<4x8x8xf32>
    "tpu.trace_stop"() : () -> ()
    %84 = vector.extract_strided_slice %83 {offsets = [0, 0, 0], sizes = [1, 8, 8], strides = [1, 1, 1]} : vector<4x8x8xf32> to vector<1x8x8xf32>
    %85 = vector.shape_cast %84 : vector<1x8x8xf32> to vector<8x8xf32>
    %c0_63 = arith.constant 0 : index
    %c0_64 = arith.constant 0 : index
    %86 = vector.load %arg20[%c0_63, %c0_64] : memref<8x32xf32, #tpu.memory_space<vmem>>, vector<8x8xf32>
    tpu.vector_store %arg20[%c0_63, %c0_64], %85 {strides = array<i32>} : memref<8x32xf32, #tpu.memory_space<vmem>>, vector<8x8xf32>,
    %87 = vector.extract_strided_slice %83 {offsets = [1, 0, 0], sizes = [1, 8, 8], strides = [1, 1, 1]} : vector<4x8x8xf32> to vector<1x8x8xf32>
    %88 = vector.shape_cast %87 : vector<1x8x8xf32> to vector<8x8xf32>
    %c0_65 = arith.constant 0 : index
    %c8 = arith.constant 8 : index
    %89 = vector.load %arg20[%c0_65, %c8] : memref<8x32xf32, #tpu.memory_space<vmem>>, vector<8x8xf32>
    tpu.vector_store %arg20[%c0_65, %c8], %88 {strides = array<i32>} : memref<8x32xf32, #tpu.memory_space<vmem>>, vector<8x8xf32>,
    %90 = vector.extract_strided_slice %83 {offsets = [2, 0, 0], sizes = [1, 8, 8], strides = [1, 1, 1]} : vector<4x8x8xf32> to vector<1x8x8xf32>
    %91 = vector.shape_cast %90 : vector<1x8x8xf32> to vector<8x8xf32>
    %c0_66 = arith.constant 0 : index
    %c16 = arith.constant 16 : index
    %92 = vector.load %arg20[%c0_66, %c16] : memref<8x32xf32, #tpu.memory_space<vmem>>, vector<8x8xf32>
    tpu.vector_store %arg20[%c0_66, %c16], %91 {strides = array<i32>} : memref<8x32xf32, #tpu.memory_space<vmem>>, vector<8x8xf32>,
    %93 = vector.extract_strided_slice %83 {offsets = [3, 0, 0], sizes = [1, 8, 8], strides = [1, 1, 1]} : vector<4x8x8xf32> to vector<1x8x8xf32>
    %94 = vector.shape_cast %93 : vector<1x8x8xf32> to vector<8x8xf32>
    %c0_67 = arith.constant 0 : index
    %c24 = arith.constant 24 : index
    %95 = vector.load %arg20[%c0_67, %c24] : memref<8x32xf32, #tpu.memory_space<vmem>>, vector<8x8xf32>
    tpu.vector_store %arg20[%c0_67, %c24], %94 {strides = array<i32>} : memref<8x32xf32, #tpu.memory_space<vmem>>, vector<8x8xf32>,
    %c0_68 = arith.constant 0 : index
    %c0_69 = arith.constant 0 : index
    %96 = vector.load %arg20[%c0_68, %c0_69] : memref<8x32xf32, #tpu.memory_space<vmem>>, vector<8x32xf32>
    %c0_70 = arith.constant 0 : index
    %c0_71 = arith.constant 0 : index
    %97 = vector.load %arg6[%c0_70, %c0_71] : memref<32x32xf32, #tpu.memory_space<vmem>>, vector<32x32xf32>
    %cst_72 = arith.constant dense<0.000000e+00> : vector<8x32xf32>
    %98 = tpu.matmul %96, %97, %cst_72 {dimension_numbers = #tpu.dot_dimension_numbers<[1], [0], [0], [1], [0, 0, 1, 1], [], []>} : vector<8x32xf32>, vector<32x32xf32>, vector<8x32xf32> -> vector<8x32xf32>
    %c0_73 = arith.constant 0 : index
    %c0_74 = arith.constant 0 : index
    %99 = vector.load %arg7[%c0_73, %c0_74] : memref<1x32xf32, #tpu.memory_space<vmem>>, vector<1x32xf32>
    %100 = vector.broadcast %99 : vector<1x32xf32> to vector<8x32xf32>
    %101 = arith.addf %98, %100 : vector<8x32xf32>
    %102 = arith.addf %56, %101 : vector<8x32xf32>
    %c0_75 = arith.constant 0 : index
    %c0_76 = arith.constant 0 : index
    %103 = vector.load %arg12[%c0_75, %c0_76] : memref<1x32xf32, #tpu.memory_space<vmem>>, vector<1x32xf32>
    %c0_77 = arith.constant 0 : index
    %c0_78 = arith.constant 0 : index
    %104 = vector.load %arg13[%c0_77, %c0_78] : memref<1x32xf32, #tpu.memory_space<vmem>>, vector<1x32xf32>
    %cst_79 = arith.constant dense<0.000000e+00> : vector<8xf32>
    %105 = vector.multi_reduction <add>, %102, %cst_79 [1] : vector<8x32xf32> to vector<8xf32>
    %106 = vector.shape_cast %105 : vector<8xf32> to vector<8x1xf32>
    %cst_80 = arith.constant 3.200000e+01 : f32
    %107 = vector.broadcast %cst_80 : f32 to vector<8x1xf32>
    %108 = arith.divf %106, %107 : vector<8x1xf32>
    %109 = vector.broadcast %108 : vector<8x1xf32> to vector<8x32xf32>
    %110 = arith.subf %102, %109 : vector<8x32xf32>
    %111 = arith.mulf %110, %110 : vector<8x32xf32>
    %cst_81 = arith.constant dense<0.000000e+00> : vector<8xf32>
    %112 = vector.multi_reduction <add>, %111, %cst_81 [1] : vector<8x32xf32> to vector<8xf32>
    %113 = vector.shape_cast %112 : vector<8xf32> to vector<8x1xf32>
    %cst_82 = arith.constant 3.200000e+01 : f32
    %114 = vector.broadcast %cst_82 : f32 to vector<8x1xf32>
    %115 = arith.divf %113, %114 : vector<8x1xf32>
    %116 = vector.broadcast %108 : vector<8x1xf32> to vector<8x32xf32>
    %117 = arith.subf %102, %116 : vector<8x32xf32>
    %cst_83 = arith.constant 9.99999974E-6 : f32
    %118 = vector.broadcast %cst_83 : f32 to vector<8x1xf32>
    %119 = arith.addf %115, %118 : vector<8x1xf32>
    %120 = math.rsqrt %119 : vector<8x1xf32>
    %121 = vector.broadcast %120 : vector<8x1xf32> to vector<8x32xf32>
    %122 = arith.mulf %117, %121 : vector<8x32xf32>
    %123 = vector.broadcast %103 : vector<1x32xf32> to vector<8x32xf32>
    %124 = arith.mulf %122, %123 : vector<8x32xf32>
    %125 = vector.broadcast %104 : vector<1x32xf32> to vector<8x32xf32>
    %126 = arith.addf %124, %125 : vector<8x32xf32>
    %c0_84 = arith.constant 0 : index
    %c0_85 = arith.constant 0 : index
    %127 = vector.load %arg8[%c0_84, %c0_85] : memref<32x64xf32, #tpu.memory_space<vmem>>, vector<32x64xf32>
    %cst_86 = arith.constant dense<0.000000e+00> : vector<8x64xf32>
    %128 = tpu.matmul %126, %127, %cst_86 {dimension_numbers = #tpu.dot_dimension_numbers<[1], [0], [0], [1], [0, 0, 1, 1], [], []>} : vector<8x32xf32>, vector<32x64xf32>, vector<8x64xf32> -> vector<8x64xf32>
    %c0_87 = arith.constant 0 : index
    %c0_88 = arith.constant 0 : index
    %129 = vector.load %arg9[%c0_87, %c0_88] : memref<1x64xf32, #tpu.memory_space<vmem>>, vector<1x64xf32>
    %130 = vector.broadcast %129 : vector<1x64xf32> to vector<8x64xf32>
    %131 = arith.addf %128, %130 : vector<8x64xf32>
    %cst_89 = arith.constant 0.000000e+00 : f32
    %132 = vector.broadcast %cst_89 : f32 to vector<8x64xf32>
    %133 = arith.maximumf %131, %132 : vector<8x64xf32>
    %c0_90 = arith.constant 0 : index
    %c0_91 = arith.constant 0 : index
    %134 = vector.load %arg10[%c0_90, %c0_91] : memref<64x32xf32, #tpu.memory_space<vmem>>, vector<64x32xf32>
    %cst_92 = arith.constant dense<0.000000e+00> : vector<8x32xf32>
    %135 = tpu.matmul %133, %134, %cst_92 {dimension_numbers = #tpu.dot_dimension_numbers<[1], [0], [0], [1], [0, 0, 1, 1], [], []>} : vector<8x64xf32>, vector<64x32xf32>, vector<8x32xf32> -> vector<8x32xf32>
    %c0_93 = arith.constant 0 : index
    %c0_94 = arith.constant 0 : index
    %136 = vector.load %arg11[%c0_93, %c0_94] : memref<1x32xf32, #tpu.memory_space<vmem>>, vector<1x32xf32>
    %137 = vector.broadcast %136 : vector<1x32xf32> to vector<8x32xf32>
    %138 = arith.addf %135, %137 : vector<8x32xf32>
    %139 = arith.addf %126, %138 : vector<8x32xf32>
    %c0_95 = arith.constant 0 : index
    %c0_96 = arith.constant 0 : index
    %140 = vector.load %arg14[%c0_95, %c0_96] : memref<1x32xf32, #tpu.memory_space<vmem>>, vector<1x32xf32>
    %c0_97 = arith.constant 0 : index
    %c0_98 = arith.constant 0 : index
    %141 = vector.load %arg15[%c0_97, %c0_98] : memref<1x32xf32, #tpu.memory_space<vmem>>, vector<1x32xf32>
    %cst_99 = arith.constant dense<0.000000e+00> : vector<8xf32>
    %142 = vector.multi_reduction <add>, %139, %cst_99 [1] : vector<8x32xf32> to vector<8xf32>
    %143 = vector.shape_cast %142 : vector<8xf32> to vector<8x1xf32>
    %cst_100 = arith.constant 3.200000e+01 : f32
    %144 = vector.broadcast %cst_100 : f32 to vector<8x1xf32>
    %145 = arith.divf %143, %144 : vector<8x1xf32>
    %146 = vector.broadcast %145 : vector<8x1xf32> to vector<8x32xf32>
    %147 = arith.subf %139, %146 : vector<8x32xf32>
    %148 = arith.mulf %147, %147 : vector<8x32xf32>
    %cst_101 = arith.constant dense<0.000000e+00> : vector<8xf32>
    %149 = vector.multi_reduction <add>, %148, %cst_101 [1] : vector<8x32xf32> to vector<8xf32>
    %150 = vector.shape_cast %149 : vector<8xf32> to vector<8x1xf32>
    %cst_102 = arith.constant 3.200000e+01 : f32
    %151 = vector.broadcast %cst_102 : f32 to vector<8x1xf32>
    %152 = arith.divf %150, %151 : vector<8x1xf32>
    %153 = vector.broadcast %145 : vector<8x1xf32> to vector<8x32xf32>
    %154 = arith.subf %139, %153 : vector<8x32xf32>
    %cst_103 = arith.constant 9.99999974E-6 : f32
    %155 = vector.broadcast %cst_103 : f32 to vector<8x1xf32>
    %156 = arith.addf %152, %155 : vector<8x1xf32>
    %157 = math.rsqrt %156 : vector<8x1xf32>
    %158 = vector.broadcast %157 : vector<8x1xf32> to vector<8x32xf32>
    %159 = arith.mulf %154, %158 : vector<8x32xf32>
    %160 = vector.broadcast %140 : vector<1x32xf32> to vector<8x32xf32>
    %161 = arith.mulf %159, %160 : vector<8x32xf32>
    %162 = vector.broadcast %141 : vector<1x32xf32> to vector<8x32xf32>
    %163 = arith.addf %161, %162 : vector<8x32xf32>
    %c0_104 = arith.constant 0 : index
    %c0_105 = arith.constant 0 : index
    %c0_106 = arith.constant 0 : index
    %164 = vector.load %arg16[%c0_104, %c0_105, %c0_106] : memref<1x8x32xf32, #tpu.memory_space<vmem>>, vector<1x8x32xf32>
    %165 = vector.shape_cast %164 : vector<1x8x32xf32> to vector<8x32xf32>
    %166 = vector.shape_cast %163 : vector<8x32xf32> to vector<1x8x32xf32>
    tpu.vector_store %arg16[%c0_104, %c0_105, %c0_106], %166 {strides = array<i32>} : memref<1x8x32xf32, #tpu.memory_space<vmem>>, vector<1x8x32xf32>,
    return
  }
  func.func @transform_0(%arg0: i32, %arg1: i32) -> (i32, i32, i32) {
    %c0_i32 = arith.constant 0 : i32
    %c0_i32_0 = arith.constant 0 : i32
    %c0_i32_1 = arith.constant 0 : i32
    return %arg0, %c0_i32, %c0_i32_0 : i32, i32, i32
  }
  func.func @transform_1(%arg0: i32, %arg1: i32) -> (i32, i32, i32, i32) {
    %c0_i32 = arith.constant 0 : i32
    %c0_i32_0 = arith.constant 0 : i32
    %c0_i32_1 = arith.constant 0 : i32
    %c0_i32_2 = arith.constant 0 : i32
    return %arg0, %c0_i32, %c0_i32_0, %c0_i32_1 : i32, i32, i32, i32
  }
  func.func @transform_2(%arg0: i32, %arg1: i32) -> (i32, i32) {
    %c0_i32 = arith.constant 0 : i32
    %c0_i32_0 = arith.constant 0 : i32
    %c0_i32_1 = arith.constant 0 : i32
    return %c0_i32, %c0_i32_0 : i32, i32
  }
  func.func @transform_3(%arg0: i32, %arg1: i32) -> (i32, i32) {
    %c0_i32 = arith.constant 0 : i32
    %c0_i32_0 = arith.constant 0 : i32
    %c0_i32_1 = arith.constant 0 : i32
    return %c0_i32, %c0_i32_0 : i32, i32
  }
  func.func @transform_4(%arg0: i32, %arg1: i32) -> (i32, i32) {
    %c0_i32 = arith.constant 0 : i32
    %c0_i32_0 = arith.constant 0 : i32
    %c0_i32_1 = arith.constant 0 : i32
    return %c0_i32, %c0_i32_0 : i32, i32
  }
  func.func @transform_5(%arg0: i32, %arg1: i32) -> (i32, i32) {
    %c0_i32 = arith.constant 0 : i32
    %c0_i32_0 = arith.constant 0 : i32
    %c0_i32_1 = arith.constant 0 : i32
    return %c0_i32, %c0_i32_0 : i32, i32
  }
  func.func @transform_6(%arg0: i32, %arg1: i32) -> (i32, i32) {
    %c0_i32 = arith.constant 0 : i32
    %c0_i32_0 = arith.constant 0 : i32
    %c0_i32_1 = arith.constant 0 : i32
    return %c0_i32, %c0_i32_0 : i32, i32
  }
  func.func @transform_7(%arg0: i32, %arg1: i32) -> (i32, i32) {
    %c0_i32 = arith.constant 0 : i32
    %c0_i32_0 = arith.constant 0 : i32
    %c0_i32_1 = arith.constant 0 : i32
    return %c0_i32, %c0_i32_0 : i32, i32
  }
  func.func @transform_8(%arg0: i32, %arg1: i32) -> (i32, i32) {
    %c0_i32 = arith.constant 0 : i32
    %c0_i32_0 = arith.constant 0 : i32
    %c0_i32_1 = arith.constant 0 : i32
    return %c0_i32, %c0_i32_0 : i32, i32
  }
  func.func @transform_9(%arg0: i32, %arg1: i32) -> (i32, i32) {
    %c0_i32 = arith.constant 0 : i32
    %c0_i32_0 = arith.constant 0 : i32
    %c0_i32_1 = arith.constant 0 : i32
    return %c0_i32, %c0_i32_0 : i32, i32
  }
  func.func @transform_10(%arg0: i32, %arg1: i32) -> (i32, i32) {
    %c0_i32 = arith.constant 0 : i32
    %c0_i32_0 = arith.constant 0 : i32
    %c0_i32_1 = arith.constant 0 : i32
    return %c0_i32, %c0_i32_0 : i32, i32
  }
  func.func @transform_11(%arg0: i32, %arg1: i32) -> (i32, i32) {
    %c0_i32 = arith.constant 0 : i32
    %c0_i32_0 = arith.constant 0 : i32
    %c0_i32_1 = arith.constant 0 : i32
    return %c0_i32, %c0_i32_0 : i32, i32
  }
  func.func @transform_12(%arg0: i32, %arg1: i32) -> (i32, i32) {
    %c0_i32 = arith.constant 0 : i32
    %c0_i32_0 = arith.constant 0 : i32
    %c0_i32_1 = arith.constant 0 : i32
    return %c0_i32, %c0_i32_0 : i32, i32
  }
  func.func @transform_13(%arg0: i32, %arg1: i32) -> (i32, i32) {
    %c0_i32 = arith.constant 0 : i32
    %c0_i32_0 = arith.constant 0 : i32
    %c0_i32_1 = arith.constant 0 : i32
    return %c0_i32, %c0_i32_0 : i32, i32
  }
  func.func @transform_14(%arg0: i32, %arg1: i32) -> (i32, i32, i32) {
    %c0_i32 = arith.constant 0 : i32
    %c0_i32_0 = arith.constant 0 : i32
    return %arg0, %arg1, %c0_i32 : i32, i32, i32
  }
}

</mosaic_0001>

<bundles_post_ra>
// kernel: tpu_custom_call.1
= control target key start
LH: loop header
LB: loop body
LE: loop exit
PB: predicated region body
PF: predicated region fallthrough
CT: control target
= control target key end

     0   :  { %s3759_s0 = inlined_call_operand.hbm [shape: f32[2,8,32], index: 0, kind: input, shape index: {}]   ;;  %s3760_s1 = inlined_call_operand.hbm [shape: f32[2,1,1,8], index: 1, kind: input, shape index: {}]   ;;  %s3761_s2 = inlined_call_operand.hbm [shape: f32[32,96], index: 2, kind: input, shape index: {}]   ;;  %s3762_s3 = inlined_call_operand.hbm [shape: f32[1,96], index: 3, kind: input, shape index: {}]   ;;  %s3763_s4 = inlined_call_operand.hbm [shape: f32[32,32], index: 4, kind: input, shape index: {}]   ;;  %s3764_s5 = inlined_call_operand.hbm [shape: f32[1,32], index: 5, kind: input, shape index: {}]   ;;  %s3765_s6 = inlined_call_operand.hbm [shape: f32[32,64], index: 6, kind: input, shape index: {}]   ;;  %s3766_s7 = inlined_call_operand.hbm [shape: f32[1,64], index: 7, kind: input, shape index: {}]   ;;  %s3767_s8 = inlined_call_operand.hbm [shape: f32[64,32], index: 8, kind: input, shape index: {}]   ;;  %s3768_s9 = inlined_call_operand.hbm [shape: f32[1,32], index: 9, kind: input, shape index: {}]   ;;  %s3769_s10 = inlined_call_operand.hbm [shape: f32[1,32], index: 10, kind: input, shape index: {}]   ;;  %s3770_s11 = inlined_call_operand.hbm [shape: f32[1,32], index: 11, kind: input, shape index: {}]   ;;  %s3771_s12 = inlined_call_operand.hbm [shape: f32[1,32], index: 12, kind: input, shape index: {}]   ;;  %s3772_s13 = inlined_call_operand.hbm [shape: f32[1,32], index: 13, kind: input, shape index: {}]   ;;  %s3773_s14 = inlined_call_operand.hbm [shape: f32[2,8,32], index: 14, kind: output, shape index: {}]  }
   0x1   :  { %3788 = sst [smem:[#allocation45_spill]] %s3759_s0 }
   0x2   :  { %3789 = sst [smem:[#allocation46_spill]] %s3760_s1 }
   0x3   :  { %3790 = sst [smem:[#allocation47_spill]] %s3761_s2 }
   0x4   :  { %3791 = sst [smem:[#allocation48_spill]] %s3762_s3 }
   0x5   :  { %3792 = sst [smem:[#allocation49_spill]] %s3763_s4 }
   0x6   :  { %3793 = sst [smem:[#allocation50_spill]] %s3764_s5 }
   0x7   :  { %3794 = sst [smem:[#allocation51_spill]] %s3765_s6 }
   0x8   :  { %3795 = sst [smem:[#allocation52_spill]] %s3773_s14 }
   0x9   :  { %19 = vsyncpa [#allocation7], 0 }
   0xa   :  { %21 = vsyncpa [#allocation7 + $0x1], 0 }
   0xb   :  { %22 = vsyncpa [#allocation10], 0 }
   0xc   :  { %24 = vsyncpa [#allocation10 + $0x1], 0 }
   0xd   :  { %25 = vsyncpa [#allocation13], 0 }
   0xe   :  { %26 = vsyncpa [#allocation16], 0 }
   0xf   :  { %27 = vsyncpa [#allocation19], 0 }
  0x10   :  { %28 = vsyncpa [#allocation22], 0 }
  0x11   :  { %29 = vsyncpa [#allocation25], 0 }
  0x12   :  { %30 = vsyncpa [#allocation28], 0 }
  0x13   :  { %31 = vsyncpa [#allocation8], 0 }
  0x14   :  { %33 = vsyncpa [#allocation8 + $0x1], 0  ;;  %s3141_s29 = smov 0   ;;  %s3143_s30 = smov 0  }
  0x15   :  { %s3145_s15 = smov 0   ;;  %s3147_s16 = smov 0  }
  0x16   :  { %s3149_s17 = smov 0   ;;  %s3151_s18 = smov 0  }
  0x17 LB: > { %3796 = sst [smem:[#allocation40_spill]] %s3010_s29  ;;  %s3172_s19 = sadd.s32 4294967295, %s3030_s18   ;;  %s3030_s18 = sphi %s3151_s18, %s39_s18   ;;  %s3026_s17 = sphi %s3149_s17, %s3852_s17   ;;  %s3022_s16 = sphi %s3147_s16, %s3851_s16   ;;  %s3018_s15 = sphi %s3145_s15, %s3850_s15   ;;  %s3014_s30 = sphi %s3143_s30, %s3849_s30   ;;  %s3010_s29 = sphi %s3141_s29, %s3847_s29  }
  0x18   : > { %3797 = sst [smem:[#allocation41_spill]] %s3014_s30  ;;  %p2071_p0 = scmp.ge.s32.totalorder %s3030_s18, 1 }
  0x19   : > { %3798 = sst [smem:[#allocation42_spill]] %s3022_s16  ;;  %p3782_p1 = scmp.eq.s32.totalorder %s3172_s19, 0 }
  0x1a   : > { %3799 = sst [smem:[#allocation43_spill]] %s3172_s19  ;;  %p388_p2 = scmp.lt.s32.totalorder %s3030_s18, 3 }
  0x1b   : > { %s3032_s21 = smov [#allocation11]   ;;  %s3033_s24 = smov [#allocation12]  }
  0x1c   : > { %p3177_p3 = pnand %p2071_p0, %p388_p2  ;;  %s400_s22 = sshll.u32 %s3032_s21, 4  ;;  %s3181_s22 = int_to_ptr.vmem [resolvable:$true] %s400_s22 }
  0x1d   : > { %s414_s25 = sshll.u32 %s3033_s24, 4  ;;  %s3034_s26 = smov [#allocation15]   ;;  %s3192_s25 = int_to_ptr.vmem [resolvable:$true] %s414_s25 }
  0x1e   : > { %s3800_s20 = scalar_select %p3177_p3, 1, 0 }
  0x1f   : > { %p2347_p4 = pneg %p3177_p3  ;;  %s3194_s27 = sshll.u32 %s3034_s26, 4  ;;  %s439_s27 = int_to_ptr.vmem [resolvable:$true] %s3194_s27 }
  0x20   : > { %3801 = sst [smem:[#allocation44_spill]] %s3800_s20  ;;  %s3803_s2 = sld [smem:[#allocation47_spill]] }
  0x21   : > { %p3188_p6 = pnand %p2347_p4, %p3782_p1 }
  0x23   : > { %p3204_p8 = pneg %p3188_p6 }
  0x26   : > { %s2520_s14 = scalar_lea.hbm %s3803_s2, 512 }
  0x27   : > { %p2521_p7 = scmp.ne.s32.totalorder %s3803_s2, %s2520_s14  ;;  %p2527_p11 = scmp.lt.u32.totalorder %s2520_s14, %s3803_s2 }
  0x29   : > { %p2523_p9 = pnand %p3204_p8, %p2521_p7 }
  0x2b   : > { %p2524_p10 = pneg %p2523_p9 }
  0x2d   : > { %p2529_p12 = pnand %p2527_p11, %p2524_p10 }
  0x2f   : > { %2532 = shalt.err (!%p2529_p12)
}
  0x30   : > { %s2533_s16 = scalar_lea.vmem %s3181_s22, 512  ;;  %p2541_p4 = scmp.lt.s32.totalorder %s3181_s22, %s3181_s22 }
  0x31   : > { %p2534_p13 = scmp.ne.s32.totalorder %s3181_s22, %s2533_s16  ;;  %p2542_p5 = scmp.lt.s32.totalorder %s2533_s16, %s2533_s16 }
  0x33   : > { %p2536_p0 = pnand %p2534_p13, %p3204_p8  ;;  %p2543_p7 = por %p2542_p5, %p2541_p4 }
  0x35   : > { %p2537_p2 = pneg %p2536_p0 }
  0x37   : > { %p2544_p9 = pnand %p2543_p7, %p2537_p2 }
  0x39   : > { %2547 = shalt.err (!%p2544_p9)
}
  0x3a   : > { %s3784_s20 = smov 128   ;;  %s3036_s14 = smov 8  }
  0x3b   : > { %2350 = dma.hbm_to_vmem [thread:$0]  (!%p3188_p6), %s3803_s2, 512, %s3181_s22, [#allocation10], %s3784_s20, %s3784_s20, %s3036_s14  }
  0x3c   : > { %s3805_s3 = sld [smem:[#allocation48_spill]] }
  0x42   : > { %s2548_s16 = scalar_lea.hbm %s3805_s3, 16 }
  0x43   : > { %p2549_p5 = scmp.ne.s32.totalorder %s3805_s3, %s2548_s16  ;;  %p2555_p12 = scmp.lt.u32.totalorder %s2548_s16, %s3805_s3 }
  0x45   : > { %p2551_p10 = pnand %p2549_p5, %p3204_p8 }
  0x47   : > { %p2552_p11 = pneg %p2551_p10 }
  0x49   : > { %p2557_p13 = pnand %p2555_p12, %p2552_p11 }
  0x4b   : > { %2560 = shalt.err (!%p2557_p13)
}
  0x4c   : > { %s2561_s22 = scalar_lea.vmem %s3192_s25, 16  ;;  %s2568_s0 = scalar_lea.vmem %s3192_s25, 32 }
  0x4d   : > { %p2562_p0 = scmp.ne.s32.totalorder %s3192_s25, %s2561_s22  ;;  %p2569_p7 = scmp.lt.s32.totalorder %s3192_s25, %s3192_s25 }
  0x4e   : > { %p2570_p9 = scmp.lt.s32.totalorder %s2568_s0, %s2561_s22 }
  0x4f   : > { %p2564_p2 = pnand %p2562_p0, %p3204_p8 }
  0x50   : > { %p2571_p5 = por %p2570_p9, %p2569_p7 }
  0x51   : > { %p2565_p4 = pneg %p2564_p2 }
  0x53   : > { %p2572_p10 = pnand %p2571_p5, %p2565_p4 }
  0x55   : > { %2575 = shalt.err (!%p2572_p10)
}
  0x56   : > { %2353 = dma.hbm_to_vmem [thread:$0]  (!%p3188_p6), %s3805_s3, 16, %s3192_s25, [#allocation13]  }
  0x57   : > { %s3806_s5 = sld [smem:[#allocation50_spill]] }
  0x5d   : > { %s2576_s21 = scalar_lea.hbm %s3806_s5, 16 }
  0x5e   : > { %p2577_p11 = scmp.ne.s32.totalorder %s3806_s5, %s2576_s21  ;;  %p2583_p0 = scmp.lt.u32.totalorder %s2576_s21, %s3806_s5 }
  0x60   : > { %p2579_p12 = pnand %p2577_p11, %p3204_p8 }
  0x62   : > { %p2580_p13 = pneg %p2579_p12 }
  0x64   : > { %p2585_p2 = pnand %p2583_p0, %p2580_p13 }
  0x66   : > { %2588 = shalt.err (!%p2585_p2)
}
  0x67   : > { %s2589_s0 = scalar_lea.vmem %s439_s27, 16  ;;  %s2596_s25 = scalar_lea.vmem %s439_s27, 32 }
  0x68   : > { %p2590_p4 = scmp.ne.s32.totalorder %s439_s27, %s2589_s0  ;;  %p2597_p5 = scmp.lt.s32.totalorder %s439_s27, %s439_s27 }
  0x69   : > { %p2598_p10 = scmp.lt.s32.totalorder %s2596_s25, %s2589_s0 }
  0x6a   : > { %p2592_p7 = pnand %p2590_p4, %p3204_p8 }
  0x6b   : > { %p2599_p1 = por %p2598_p10, %p2597_p5 }
  0x6c   : > { %p2593_p9 = pneg %p2592_p7 }
  0x6e   : > { %p2600_p3 = pnand %p2599_p1, %p2593_p9 }
  0x70   : > { %2603 = shalt.err (!%p2600_p3)
}
  0x71   : > { %2359 = dma.hbm_to_vmem [thread:$0]  (!%p3188_p6), %s3806_s5, 16, %s439_s27, [#allocation16]  }
  0x72   : > { %s3037_s19 = smov [#allocation18]   ;;  %s3038_s21 = smov [#allocation21]  }
  0x73   : > { %s462_s28 = sshll.u32 %s3037_s19, 4  ;;  %s486_s24 = sshll.u32 %s3038_s21, 4  ;;  %s463_s28 = int_to_ptr.vmem [resolvable:$true] %s462_s28  ;;  %s487_s24 = int_to_ptr.vmem [resolvable:$true] %s486_s24 }
  0x74   : > { %s2604_s22 = scalar_lea.hbm %s3766_s7, 16 }
  0x75   : > { %p2605_p1 = scmp.ne.s32.totalorder %s3766_s7, %s2604_s22  ;;  %p2611_p12 = scmp.lt.u32.totalorder %s2604_s22, %s3766_s7 }
  0x77   : > { %p2607_p3 = pnand %p2605_p1, %p3204_p8 }
  0x79   : > { %p2608_p11 = pneg %p2607_p3 }
  0x7b   : > { %p2613_p13 = pnand %p2611_p12, %p2608_p11 }
  0x7d   : > { %2616 = shalt.err (!%p2613_p13)
}
  0x7e   : > { %s2617_s27 = scalar_lea.vmem %s463_s28, 16  ;;  %s2624_s30 = scalar_lea.vmem %s463_s28, 32 }
  0x7f   : > { %p2618_p0 = scmp.ne.s32.totalorder %s463_s28, %s2617_s27  ;;  %p2625_p7 = scmp.lt.s32.totalorder %s463_s28, %s463_s28 }
  0x80   : > { %p2626_p9 = scmp.lt.s32.totalorder %s2624_s30, %s2617_s27 }
  0x81   : > { %p2620_p2 = pnand %p2618_p0, %p3204_p8 }
  0x82   : > { %p2627_p5 = por %p2626_p9, %p2625_p7 }
  0x83   : > { %p2621_p4 = pneg %p2620_p2 }
  0x85   : > { %p2628_p10 = pnand %p2627_p5, %p2621_p4 }
  0x87   : > { %2631 = shalt.err (!%p2628_p10)
}
  0x88   : > { %2365 = dma.hbm_to_vmem [thread:$0]  (!%p3188_p6), %s3766_s7, 16, %s463_s28, [#allocation19]  }
  0x89   : > { %s2632_s16 = scalar_lea.hbm %s3768_s9, 16 }
  0x8a   : > { %p2633_p1 = scmp.ne.s32.totalorder %s3768_s9, %s2632_s16  ;;  %p2639_p12 = scmp.lt.u32.totalorder %s2632_s16, %s3768_s9 }
  0x8c   : > { %p2635_p3 = pnand %p2633_p1, %p3204_p8 }
  0x8e   : > { %p2636_p11 = pneg %p2635_p3 }
  0x90   : > { %p2641_p13 = pnand %p2639_p12, %p2636_p11 }
  0x92   : > { %2644 = shalt.err (!%p2641_p13)
}
  0x93   : > { %s2645_s27 = scalar_lea.vmem %s487_s24, 16  ;;  %s2652_s28 = scalar_lea.vmem %s487_s24, 32 }
  0x94   : > { %p2646_p0 = scmp.ne.s32.totalorder %s487_s24, %s2645_s27  ;;  %p2653_p7 = scmp.lt.s32.totalorder %s487_s24, %s487_s24 }
  0x95   : > { %p2654_p9 = scmp.lt.s32.totalorder %s2652_s28, %s2645_s27 }
  0x96   : > { %p2648_p2 = pnand %p2646_p0, %p3204_p8 }
  0x97   : > { %p2655_p5 = por %p2654_p9, %p2653_p7 }
  0x98   : > { %p2649_p4 = pneg %p2648_p2 }
  0x9a   : > { %p2656_p10 = pnand %p2655_p5, %p2649_p4 }
  0x9c   : > { %2659 = shalt.err (!%p2656_p10)
}
  0x9d   : > { %2371 = dma.hbm_to_vmem [thread:$0]  (!%p3188_p6), %s3768_s9, 16, %s487_s24, [#allocation22]  }
  0x9e   : > { %s3039_s21 = smov [#allocation24]   ;;  %s3040_s26 = smov [#allocation14]  }
  0x9f   : > { %s508_s20 = sshll.u32 %s3039_s21, 4  ;;  %s424_s16 = sshll.u32 %s3040_s26, 4  ;;  %s509_s20 = int_to_ptr.vmem [resolvable:$true] %s508_s20  ;;  %s425_s16 = int_to_ptr.vmem [resolvable:$true] %s424_s16 }
  0xa0   : > { %s2660_s25 = scalar_lea.hbm %s3770_s11, 16 }
  0xa1   : > { %p2661_p1 = scmp.ne.s32.totalorder %s3770_s11, %s2660_s25  ;;  %p2667_p12 = scmp.lt.u32.totalorder %s2660_s25, %s3770_s11 }
  0xa3   : > { %p2663_p3 = pnand %p2661_p1, %p3204_p8 }
  0xa5   : > { %p2664_p11 = pneg %p2663_p3 }
  0xa7   : > { %p2669_p13 = pnand %p2667_p12, %p2664_p11 }
  0xa9   : > { %2672 = shalt.err (!%p2669_p13)
}
  0xaa   : > { %s2673_s24 = scalar_lea.vmem %s509_s20, 16  ;;  %s2680_s19 = scalar_lea.vmem %s509_s20, 32 }
  0xab   : > { %p2674_p0 = scmp.ne.s32.totalorder %s509_s20, %s2673_s24  ;;  %p2681_p7 = scmp.lt.s32.totalorder %s509_s20, %s509_s20 }
  0xac   : > { %p2682_p9 = scmp.lt.s32.totalorder %s2680_s19, %s2673_s24 }
  0xad   : > { %p2676_p2 = pnand %p2674_p0, %p3204_p8 }
  0xae   : > { %p2683_p5 = por %p2682_p9, %p2681_p7 }
  0xaf   : > { %p2677_p4 = pneg %p2676_p2 }
  0xb1   : > { %p2684_p10 = pnand %p2683_p5, %p2677_p4 }
  0xb3   : > { %2687 = shalt.err (!%p2684_p10)
}
  0xb4   : > { %2377 = dma.hbm_to_vmem [thread:$0]  (!%p3188_p6), %s3770_s11, 16, %s509_s20, [#allocation25]  }
  0xb5   : > { %s3807_s4 = sld [smem:[#allocation49_spill]] }
  0xbb   : > { %s2688_s25 = scalar_lea.hbm %s3807_s4, 512 }
  0xbc   : > { %p2689_p1 = scmp.ne.s32.totalorder %s3807_s4, %s2688_s25  ;;  %p2695_p12 = scmp.lt.u32.totalorder %s2688_s25, %s3807_s4 }
  0xbe   : > { %p2691_p3 = pnand %p2689_p1, %p3204_p8 }
  0xc0   : > { %p2692_p11 = pneg %p2691_p3 }
  0xc2   : > { %p2697_p13 = pnand %p2695_p12, %p2692_p11 }
  0xc4   : > { %2700 = shalt.err (!%p2697_p13)
}
  0xc5   : > { %s2701_s24 = scalar_lea.vmem %s425_s16, 512  ;;  %p2709_p7 = scmp.lt.s32.totalorder %s425_s16, %s425_s16 }
  0xc6   : > { %p2702_p0 = scmp.ne.s32.totalorder %s425_s16, %s2701_s24  ;;  %p2710_p9 = scmp.lt.s32.totalorder %s2701_s24, %s2701_s24 }
  0xc8   : > { %p2704_p2 = pnand %p2702_p0, %p3204_p8  ;;  %p2711_p5 = por %p2710_p9, %p2709_p7 }
  0xca   : > { %p2705_p4 = pneg %p2704_p2 }
  0xcc   : > { %p2712_p10 = pnand %p2711_p5, %p2705_p4 }
  0xce   : > { %2715 = shalt.err (!%p2712_p10)
}
  0xcf   : > { %s3808_s20 = smov 128   ;;  %s3041_s26 = smov [#allocation17]  }
  0xd0   : > { %2356 = dma.hbm_to_vmem [thread:$0]  (!%p3188_p6), %s3807_s4, 512, %s425_s16, [#allocation13], %s3808_s20, %s3808_s20, %s3036_s14  }
  0xd1   : > { %s448_s22 = sshll.u32 %s3041_s26, 4  ;;  %s3042_s0 = smov [#allocation20]   ;;  %s449_s22 = int_to_ptr.vmem [resolvable:$true] %s448_s22 }
  0xd2   : > { %s472_s25 = sshll.u32 %s3042_s0, 4  ;;  %s3809_s6 = sld [smem:[#allocation51_spill]]  ;;  %s473_s25 = int_to_ptr.vmem [resolvable:$true] %s472_s25 }
  0xd8   : > { %s2716_s28 = scalar_lea.hbm %s3809_s6, 512 }
  0xd9   : > { %p2717_p1 = scmp.ne.s32.totalorder %s3809_s6, %s2716_s28  ;;  %p2723_p12 = scmp.lt.u32.totalorder %s2716_s28, %s3809_s6 }
  0xdb   : > { %p2719_p3 = pnand %p2717_p1, %p3204_p8 }
  0xdd   : > { %p2720_p11 = pneg %p2719_p3 }
  0xdf   : > { %p2725_p13 = pnand %p2723_p12, %p2720_p11 }
  0xe1   : > { %2728 = shalt.err (!%p2725_p13)
}
  0xe2   : > { %s2729_s16 = scalar_lea.vmem %s449_s22, 512  ;;  %p2737_p7 = scmp.lt.s32.totalorder %s449_s22, %s449_s22 }
  0xe3   : > { %p2730_p0 = scmp.ne.s32.totalorder %s449_s22, %s2729_s16  ;;  %p2738_p9 = scmp.lt.s32.totalorder %s2729_s16, %s2729_s16 }
  0xe5   : > { %p2732_p2 = pnand %p2730_p0, %p3204_p8  ;;  %p2739_p5 = por %p2738_p9, %p2737_p7 }
  0xe7   : > { %p2733_p4 = pneg %p2732_p2 }
  0xe9   : > { %p2740_p10 = pnand %p2739_p5, %p2733_p4 }
  0xeb   : > { %2743 = shalt.err (!%p2740_p10)
}
  0xec   : > { %2362 = dma.hbm_to_vmem [thread:$0]  (!%p3188_p6), %s3809_s6, 512, %s449_s22, [#allocation16], %s3808_s20, %s3808_s20, %s3036_s14  }
  0xed   : > { %s2744_s29 = scalar_lea.hbm %s3767_s8, 1024 }
  0xee   : > { %p2745_p1 = scmp.ne.s32.totalorder %s3767_s8, %s2744_s29  ;;  %p2751_p12 = scmp.lt.u32.totalorder %s2744_s29, %s3767_s8 }
  0xf0   : > { %p2747_p3 = pnand %p2745_p1, %p3204_p8 }
  0xf2   : > { %p2748_p11 = pneg %p2747_p3 }
  0xf4   : > { %p2753_p13 = pnand %p2751_p12, %p2748_p11 }
  0xf6   : > { %2756 = shalt.err (!%p2753_p13)
}
  0xf7   : > { %s2757_s19 = scalar_lea.vmem %s473_s25, 1024  ;;  %p2765_p7 = scmp.lt.s32.totalorder %s473_s25, %s473_s25 }
  0xf8   : > { %p2758_p0 = scmp.ne.s32.totalorder %s473_s25, %s2757_s19  ;;  %p2766_p9 = scmp.lt.s32.totalorder %s2757_s19, %s2757_s19 }
  0xfa   : > { %p2760_p2 = pnand %p2758_p0, %p3204_p8  ;;  %p2767_p5 = por %p2766_p9, %p2765_p7 }
  0xfc   : > { %p2761_p4 = pneg %p2760_p2 }
  0xfe   : > { %p2768_p10 = pnand %p2767_p5, %p2761_p4 }
 0x100   : > { %2771 = shalt.err (!%p2768_p10)
}
 0x101   : > { %2368 = dma.hbm_to_vmem [thread:$0]  (!%p3188_p6), %s3767_s8, 1024, %s473_s25, [#allocation19], %s3808_s20, %s3808_s20, %s3036_s14  }
 0x102   : > { %s3043_s2 = smov [#allocation23]   ;;  %s3044_s26 = smov [#allocation26]  }
 0x103   : > { %s497_s21 = sshll.u32 %s3043_s2, 4  ;;  %s519_s0 = sshll.u32 %s3044_s26, 4  ;;  %s498_s21 = int_to_ptr.vmem [resolvable:$true] %s497_s21  ;;  %s520_s0 = int_to_ptr.vmem [resolvable:$true] %s519_s0 }
 0x104   : > { %s2772_s28 = scalar_lea.hbm %s3769_s10, 16 }
 0x105   : > { %p2773_p1 = scmp.ne.s32.totalorder %s3769_s10, %s2772_s28  ;;  %p2779_p12 = scmp.lt.u32.totalorder %s2772_s28, %s3769_s10 }
 0x107   : > { %p2775_p3 = pnand %p2773_p1, %p3204_p8 }
 0x109   : > { %p2776_p11 = pneg %p2775_p3 }
 0x10b   : > { %p2781_p13 = pnand %p2779_p12, %p2776_p11 }
 0x10d   : > { %2784 = shalt.err (!%p2781_p13)
}
 0x10e   : > { %s2785_s14 = scalar_lea.vmem %s498_s21, 16  ;;  %s2792_s20 = scalar_lea.vmem %s498_s21, 32 }
 0x10f   : > { %p2786_p0 = scmp.ne.s32.totalorder %s498_s21, %s2785_s14  ;;  %p2793_p7 = scmp.lt.s32.totalorder %s498_s21, %s498_s21 }
 0x110   : > { %p2794_p9 = scmp.lt.s32.totalorder %s2792_s20, %s2785_s14 }
 0x111   : > { %p2788_p2 = pnand %p2786_p0, %p3204_p8 }
 0x112   : > { %p2795_p5 = por %p2794_p9, %p2793_p7 }
 0x113   : > { %p2789_p4 = pneg %p2788_p2 }
 0x115   : > { %p2796_p10 = pnand %p2795_p5, %p2789_p4 }
 0x117   : > { %2799 = shalt.err (!%p2796_p10)
}
 0x118   : > { %2374 = dma.hbm_to_vmem [thread:$0]  (!%p3188_p6), %s3769_s10, 16, %s498_s21, [#allocation22]  }
 0x119   : > { %s2800_s29 = scalar_lea.hbm %s3771_s12, 16 }
 0x11a   : > { %p2801_p1 = scmp.ne.s32.totalorder %s3771_s12, %s2800_s29  ;;  %p2807_p12 = scmp.lt.u32.totalorder %s2800_s29, %s3771_s12 }
 0x11c   : > { %p2803_p3 = pnand %p2801_p1, %p3204_p8 }
 0x11e   : > { %p2804_p11 = pneg %p2803_p3 }
 0x120   : > { %p2809_p13 = pnand %p2807_p12, %p2804_p11 }
 0x122   : > { %2812 = shalt.err (!%p2809_p13)
}
 0x123   : > { %s2813_s19 = scalar_lea.vmem %s520_s0, 16  ;;  %s2820_s21 = scalar_lea.vmem %s520_s0, 32 }
 0x124   : > { %p2814_p0 = scmp.ne.s32.totalorder %s520_s0, %s2813_s19  ;;  %p2821_p7 = scmp.lt.s32.totalorder %s520_s0, %s520_s0 }
 0x125   : > { %p2822_p9 = scmp.lt.s32.totalorder %s2820_s21, %s2813_s19 }
 0x126   : > { %p2816_p2 = pnand %p2814_p0, %p3204_p8 }
 0x127   : > { %p2823_p5 = por %p2822_p9, %p2821_p7 }
 0x128   : > { %p2817_p4 = pneg %p2816_p2 }
 0x12a   : > { %p2824_p10 = pnand %p2823_p5, %p2817_p4 }
 0x12c   : > { %2827 = shalt.err (!%p2824_p10)
}
 0x12d   : > { %2380 = dma.hbm_to_vmem [thread:$0]  (!%p3188_p6), %s3771_s12, 16, %s520_s0, [#allocation25]  }
 0x12e   : > { %s3045_s20 = smov [#allocation27]   ;;  %s2828_s26 = scalar_lea.hbm %s3772_s13, 16 }
 0x12f   : > { %s530_s25 = sshll.u32 %s3045_s20, 4  ;;  %p2829_p1 = scmp.ne.s32.totalorder %s3772_s13, %s2828_s26  ;;  %s531_s25 = int_to_ptr.vmem [resolvable:$true] %s530_s25 }
 0x130   : > { %p2835_p12 = scmp.lt.u32.totalorder %s2828_s26, %s3772_s13 }
 0x131   : > { %p2831_p3 = pnand %p2829_p1, %p3204_p8 }
 0x133   : > { %p2832_p11 = pneg %p2831_p3 }
 0x135   : > { %p2837_p13 = pnand %p2835_p12, %p2832_p11 }
 0x137   : > { %2840 = shalt.err (!%p2837_p13)
}
 0x138   : > { %s2841_s0 = scalar_lea.vmem %s531_s25, 16  ;;  %s2848_s24 = scalar_lea.vmem %s531_s25, 32 }
 0x139   : > { %p2842_p0 = scmp.ne.s32.totalorder %s531_s25, %s2841_s0  ;;  %p2849_p7 = scmp.lt.s32.totalorder %s531_s25, %s531_s25 }
 0x13a   : > { %p2850_p9 = scmp.lt.s32.totalorder %s2848_s24, %s2841_s0 }
 0x13b   : > { %p2844_p2 = pnand %p2842_p0, %p3204_p8 }
 0x13c   : > { %p2851_p5 = por %p2850_p9, %p2849_p7 }
 0x13d   : > { %p2845_p4 = pneg %p2844_p2 }
 0x13f   : > { %p2852_p10 = pnand %p2851_p5, %p2845_p4 }
 0x141   : > { %2855 = shalt.err (!%p2852_p10)
}
 0x142   : > { %s3810_s22 = sld [smem:[#allocation41_spill]]  ;;  %s3811_s1 = sld [smem:[#allocation40_spill]] }
 0x143   : > { %s3812_s14 = sld [smem:[#allocation43_spill]]  ;;  %s2070_s20 = sadd.s32 4294967294, %s3030_s18  }
 0x144   : > { %2383 = dma.hbm_to_vmem [thread:$0]  (!%p3188_p6), %s3772_s13, 16, %s531_s25, [#allocation28]  }
 0x145   : > { %s51_s16 = sadd.s32 1, %s3026_s17  ;;  %s58_s23 = sadd.s32 1, %s3018_s15 }
 0x146   : > { %p53_p8 = scmp.ge.s32.totalorder %s51_s16, 2  ;;  %p66_p3 = scmp.eq.s32.totalorder %s3030_s18, 0 }
 0x147   : > { %p381_p7 = scmp.eq.s32.totalorder %s2070_s20, 1  ;;  %p2407_p5 = scmp.lt.s32.totalorder %s3030_s18, 2 }
 0x148   : > { %p65_p1 = scmp.ne.s32.totalorder %s3018_s15, %s3810_s22  ;;  %s3854_s16 = smov (%p53_p8, %s51_s16), 0 }
 0x149   : > { %p71_p12 = scmp.ne.s32.totalorder %s3810_s22, %s3811_s1  ;;  %s55_s25 = ssub.s32 %s3026_s17, %s3854_s16 }
 0x14a   : > { %p3450_p11 = por %p66_p3, %p65_p1  ;;  %p375_p6 = scmp.eq.s32.totalorder %s3812_s14, 1 }
 0x14b   : > { %p56_p13 = scmp.eq.s32.totalorder %s55_s25, 0  ;;  %p3814_p0 = scmp.eq.s32.totalorder %s3812_s14, 0 }
 0x14c   : > { %p3465_p4 = por %p375_p6, %p65_p1  ;;  %p3472_p9 = por %p381_p7, %p71_p12 }
 0x14d   : > { %p3461_p2 = por %p3814_p0, %p71_p12  ;;  %s3478_s30 = sand.u32 1, %s3018_s15  }
 0x14e   : > { %s3816_s29 = scalar_select %p3465_p4, 1, 0 }
 0x14f   : > { %s3815_s26 = scalar_select %p3461_p2, 1, 0 }
 0x150   : > { %s3470_s27 = scalar_select %p56_p13, %s3018_s15, %s58_s23  }
 0x151   : > { %s3817_s28 = scalar_select %p3472_p9, 1, 0 }
 0x152   : > { %s2086_s0 = sshll.u32 %s3026_s17, 7  ;;  %s2085_s24 = sshll.u32 %s3478_s30, 3 }
 0x153   : > { %s3818_s22 = sld [smem:[#allocation45_spill]]  ;;  %s545_s14 = scalar_lea.vmem [#allocation6], %s2085_s24 }
 0x154   : > { %s552_s20 = sshll.u32 %s545_s14, 4  ;;  %p3489_p10 = pnand %p2407_p5, %p3450_p11  ;;  %s3493_s20 = int_to_ptr.vmem [resolvable:$true] %s552_s20 }
 0x155   : > { %s542_s3 = scalar_lea.sflag [#allocation7], %s3478_s30 }
 0x156   : > { %p2858_p1 = pneg %p3489_p10 }
 0x159   : > { %s3485_s1 = scalar_lea.hbm %s3818_s22, %s2086_s0  ;;  %s2861_s24 = scalar_lea.hbm %s3818_s22, 256 }
 0x15a   : > { %s2856_s19 = scalar_lea.hbm %s3485_s1, 128  ;;  %p2862_p11 = scmp.lt.u32.totalorder %s3485_s1, %s3818_s22 }
 0x15b   : > { %p2857_p8 = scmp.ne.s32.totalorder %s3485_s1, %s2856_s19  ;;  %p2863_p6 = scmp.lt.u32.totalorder %s2861_s24, %s2856_s19 }
 0x15c   : > { %p2865_p0 = scmp.lt.u32.totalorder %s2856_s19, %s3485_s1 }
 0x15d   : > { %p2859_p3 = pnand %p2858_p1, %p2857_p8  ;;  %p2864_p13 = por %p2863_p6, %p2862_p11 }
 0x15f   : > { %p2860_p12 = pneg %p2859_p3  ;;  %p2866_p7 = por %p2865_p0, %p2864_p13 }
 0x161   : > { %p2867_p5 = pnand %p2866_p7, %p2860_p12 }
 0x163   : > { %2870 = shalt.err (!%p2867_p5)
}
 0x164   : > { %s2871_s25 = scalar_lea.vmem %s3493_s20, 128  ;;  %s3046_s0 = smov [#allocation6]  }
 0x165   : > { %p2872_p8 = scmp.ne.s32.totalorder %s3493_s20, %s2871_s25  ;;  %s2876_s2 = sshll.u32 %s3046_s0, 4  ;;  %s2877_s2 = int_to_ptr.vmem [resolvable:$false] %s2876_s2 }
 0x166   : > { %s2878_s21 = scalar_lea.vmem %s2877_s2, 256  ;;  %p2879_p4 = scmp.lt.s32.totalorder %s3493_s20, %s2877_s2 }
 0x167   : > { %p2874_p3 = pnand %p2872_p8, %p2858_p1  ;;  %p2880_p11 = scmp.lt.s32.totalorder %s2878_s21, %s2871_s25 }
 0x169   : > { %p2875_p9 = pneg %p2874_p3  ;;  %p2881_p6 = por %p2880_p11, %p2879_p4 }
 0x16b   : > { %p2882_p13 = pnand %p2881_p6, %p2875_p9 }
 0x16d   : > { %2885 = shalt.err (!%p2882_p13)
}
 0x16e   : > { %2387 = dma.hbm_to_vmem [thread:$0]  (!%p3489_p10), %s3485_s1, 128, %s3493_s20, %s542_s3  }
 0x16f   : > { %s2087_s19 = sshll.u32 %s3026_s17, 4  ;;  %s3820_s0 = sld [smem:[#allocation46_spill]] }
 0x170   : > { %s562_s25 = scalar_lea.vmem [#allocation9], %s3478_s30  ;;  %s3821_s21 = sand.u32 1, %s3030_s18  }
 0x171   : > { %s569_s2 = sshll.u32 %s562_s25, 4  ;;  %s560_s5 = scalar_lea.sflag [#allocation10], %s3821_s21  ;;  %s570_s2 = int_to_ptr.vmem [resolvable:$true] %s569_s2 }
 0x175   : > { %s3526_s4 = scalar_lea.hbm %s3820_s0, %s2087_s19  ;;  %s2891_s20 = scalar_lea.hbm %s3820_s0, 32 }
 0x176   : > { %s2886_s6 = scalar_lea.hbm %s3526_s4, 16  ;;  %p2892_p0 = scmp.lt.u32.totalorder %s3526_s4, %s3820_s0 }
 0x177   : > { %p2887_p4 = scmp.ne.s32.totalorder %s3526_s4, %s2886_s6  ;;  %p2893_p7 = scmp.lt.u32.totalorder %s2891_s20, %s2886_s6 }
 0x178   : > { %p2895_p8 = scmp.lt.u32.totalorder %s2886_s6, %s3526_s4 }
 0x179   : > { %p2889_p9 = pnand %p2887_p4, %p2858_p1  ;;  %p2894_p5 = por %p2893_p7, %p2892_p0 }
 0x17b   : > { %p2890_p12 = pneg %p2889_p9  ;;  %p2896_p3 = por %p2895_p8, %p2894_p5 }
 0x17d   : > { %p2897_p11 = pnand %p2896_p3, %p2890_p12 }
 0x17f   : > { %2900 = shalt.err (!%p2897_p11)
}
 0x180   : > { %s2901_s30 = scalar_lea.vmem %s570_s2, 16  ;;  %s3047_s14 = smov [#allocation9]  }
 0x181   : > { %p2902_p6 = scmp.ne.s32.totalorder %s570_s2, %s2901_s30  ;;  %s2906_s25 = sshll.u32 %s3047_s14, 4  ;;  %s2907_s25 = int_to_ptr.vmem [resolvable:$false] %s2906_s25 }
 0x182   : > { %s2908_s21 = scalar_lea.vmem %s2907_s25, 32  ;;  %p2909_p9 = scmp.lt.s32.totalorder %s570_s2, %s2907_s25 }
 0x183   : > { %p2904_p13 = pnand %p2902_p6, %p2858_p1  ;;  %p2910_p2 = scmp.lt.s32.totalorder %s2908_s21, %s2901_s30 }
 0x185   : > { %p2905_p4 = pneg %p2904_p13  ;;  %p2911_p0 = por %p2910_p2, %p2909_p9 }
 0x187   : > { %p2912_p7 = pnand %p2911_p0, %p2905_p4 }
 0x189   : > { %2915 = shalt.err (!%p2912_p7)
}
 0x18a   : > { %2390 = dma.hbm_to_vmem [thread:$0]  (!%p3489_p10), %s3526_s4, 16, %s570_s2, %s560_s5  }
 0x18b   : > { %s3822_s6 = sld [smem:[#allocation44_spill]] }
 0x191   : > { %p3823_p12 = scmp.ne.s32.totalorder %s3822_s6, 0 }
 0x192   : > { %s3824_s3 = sld [smem:[#allocation41_spill]] (!%p3823_p12)  ;;  %p3825_p2 = scmp.ne.s32.totalorder (!%p3823_p12), %s3815_s26, 0 }
 0x193   : > { %578 = sbr.rel (%p3823_p12) target bundleno = 2956 (0xb8c), region = 76 }
 0x198   : > { %s3553_s1 = sand.u32 (!%p3823_p12), 1, %s3824_s3  }
 0x199   : > { %s2089_s20 = sshll.u32 (!%p3823_p12), %s3553_s1, 3  ;;  %s581_s19 = scalar_lea.sflag (!%p3823_p12), [#allocation7], %s3553_s1 }
 0x19a   : > { %s3559_s24 = scalar_lea.vmem [#allocation6], %s2089_s20 }
 0x19b   : > { %2969 = dma.done.wait (%p3825_p2), %s581_s19, 128  }
 0x19c   : > { %2971 = vsyncadd (%p3825_p2), %s581_s19, 4294967168  ;;  %s3826_s4 = sld [smem:[#allocation43_spill]]  ;;  %s592_s2 = scalar_lea.vmem [#allocation9], %s3553_s1 }
 0x1a2   : > { %s589_s5 = sand.u32 1, %s3826_s4  }
 0x1a3   : > { %s590_s23 = scalar_lea.sflag [#allocation10], %s589_s5 }
 0x1a4   : > { %2973 = dma.done.wait (%p3825_p2), %s590_s23, 16  }
 0x1a5   : > { %2975 = vsyncadd (%p3825_p2), %s590_s23, 4294967280  ;;  %p3827_p10 = scmp.eq.s32.totalorder %s3826_s4, 0 }
 0x1a7   : > { %2977 = dma.done.wait (%p3827_p10), [#allocation10], 512   ;;  %p3828_p1 = pmov %p3827_p10 }
 0x1a9   : > { %2979 = vsyncadd (%p3828_p1), [#allocation10], 4294966784  ;;  %p3829_p5 = pmov %p3828_p1 }
 0x1aa   : > { %p3830_p8 = pmov %p3828_p1 }
 0x1ab   : > { %2981 = dma.done.wait (%p3829_p5), [#allocation13], 528  }
 0x1ac   : > { %2983 = vsyncadd (%p3830_p8), [#allocation13], 4294966768  ;;  %p3831_p3 = pmov %p3828_p1 }
 0x1ad   : > { %p3832_p11 = pmov %p3828_p1 }
 0x1ae   : > { %2985 = dma.done.wait (%p3831_p3), [#allocation16], 528  }
 0x1af   : > { %2987 = vsyncadd (%p3832_p11), [#allocation16], 4294966768  ;;  %p3833_p6 = pmov %p3828_p1 }
 0x1b0   : > { %p3834_p13 = pmov %p3828_p1 }
 0x1b1   : > { %2989 = dma.done.wait (%p3833_p6), [#allocation19], 1040  }
 0x1b2   : > { %2991 = vsyncadd (%p3834_p13), [#allocation19], 4294966256  ;;  %p3835_p4 = pmov %p3828_p1 }
 0x1b3   : > { %p3836_p9 = pmov %p3828_p1 }
 0x1b4   : > { %2993 = dma.done.wait (%p3835_p4), [#allocation22], 32  }
 0x1b5   : > { %2995 = vsyncadd (%p3836_p9), [#allocation22], 4294967264  ;;  %p3837_p0 = pmov %p3828_p1 }
 0x1b7   : > { %2997 = dma.done.wait (%p3837_p0), [#allocation25], 32   ;;  %p3838_p7 = pmov %p3837_p0 }
 0x1b8   : > { %p3839_p12 = pmov %p3837_p0 }
 0x1b9   : > { %2999 = vsyncadd (%p3838_p7), [#allocation25], 4294967264 }
 0x1ba   : > { %3001 = dma.done.wait (%p3839_p12), [#allocation28], 16   ;;  %p3840_p2 = pmov %p3837_p0 }
 0x1bb   : > { %v3048_v0 = vmov 0.0|0.0   ;;  %vm3049_vm0 = vmmov 0   ;;  %v3050_v1 = vmov 0.0   ;;  %v690_v2 = vld [vmem:[#allocation11] sm:$0xff]  ;;  %v691_v3 = vld [vmem:[#allocation11 + $0x8] sm:$0xff]  ;;  %v692_v4 = vld [vmem:[#allocation11 + $0x10] sm:$0xff]  ;;  %v1152_v28 = vlaneseq }
 0x1bc   : > { %3003 = vsyncadd (%p3840_p2), [#allocation28], 4294967280  ;;  %2263 = vmatprep.subr.bf16.mxu1 %v3048_v0  ;;  %2179 = vmatprep.mubr.msk.f32.mxu1 %vm3049_vm0, %v3050_v1  ;;  %v2264_v5 = vpack.c.bf16 %v691_v3, %v690_v2  ;;  %v693_v6 = vld [vmem:[#allocation11 + $0x18] sm:$0xff]  ;;  %vm701_vm1 = vcmask 261120   ;;  %v2103_v9 = vld [vmem:[#allocation12] ss:$0 sm:$0xff] }
 0x1bd   : > { %2192 = vmatprep.subr.mxu0 %v3050_v1  ;;  %2194 = vmatprep.mubr.msk.f32.mxu0 %vm3049_vm0, %v3050_v1  ;;  %v2267_v7 = vpack.c.bf16 %v693_v6, %v692_v4  ;;  %v3607_v8 = vld [vmem:[%s3559_s24] sm:$0xff]  ;;  %vm775_vm2 = vcmask 64512   ;;  %s3051_s26 = smov 120   ;;  %s3052_s30 = smov 96   ;;  %v836_v29 = vld [vmem:[%s592_s2] sm:$0x1] }
 0x1be   : > { %2265 = vmatpush3.bf16.msra.mxu1 %v2264_v5  ;;  %s3053_s14 = smov 80   ;;  %s3054_s25 = smov 88   ;;  %v1153_v30 = vshrl.u32 %v1152_v28, 7  ;;  %vm837_vm3 = vcmp.eq.f32.partialorder %v836_v29, 0.0  ;;  %vm1506_vm4 = vcmask 130112   ;;  %vm1512_vm5 = vcmask 195712  }
 0x1bf   : > { %2266 = vmatprep.subr.bf16.mxu1 %v3048_v0  ;;  %s3055_s21 = smov 112   ;;  %s3056_s6 = smov 72   ;;  %v838_v32 = vsel %vm837_vm3, -1e+09, %v3050_v1  ;;  %vm1518_vm6 = vcmask 261312   ;;  %vm1736_vm7 = vcmask 523264  }
 0x1c0   : > { %s3057_s3 = smov 104   ;;  %v1154_v31 = vsub.s32 0, %v1153_v30  ;;  %s3058_s19 = smov 56  }
 0x1c1   : > { %s3059_s24 = smov 64   ;;  %s3060_s4 = smov 48  }
 0x1c2   : > { %2268 = vmatpush3.bf16.msra.mxu1 %v2267_v7  ;;  %v1155_v33 = vrot.slane %v838_v32, %v1154_v31  ;;  %s3061_s5 = smov 40   ;;  %s3062_s23 = smov 8  }
 0x1c3   : > { %2182 = vmatprep.subr.mxu1 %v3050_v1  ;;  %s3063_s2 = smov 16   ;;  %p3843_p1 = scmp.ne.s32.totalorder %s3816_s29, 0 }
 0x1c5   : > { %2180 = vmatmul.mubr.msk.f32.vlgmr.msra.gmra.mrb[0].mxu1 %vm701_vm1, %v3607_v8 }
 0x1c6   : > { %2184 = vmatprep.mubr.msk.f32.mxu1 %vm3049_vm0, %v3050_v1 }
 0x298   : > { %v771_v10 = vpop.f32.mrb[0].mxu1 }
 0x299   : > { %v3614_v11 = vadd.f32 %v2103_v9, %v771_v10  ;;  %v2181_v12 = vpop.f32.mrb[1].mxu1 }
 0x29b   : > { %786 = vrot.lane.b32.xlu1 %v3614_v11, %s3051_s26  ;;  %778 = vrot.lane.b32.xlu0 %v3614_v11, %s3052_s30  ;;  %776 = vst.msk [vmem:[#allocation2] sm:$0xff] %vm775_vm2, %v3614_v11  ;;  %s3064_s26 = smov 24   ;;  %s3841_s30 = sld [smem:[#allocation42_spill]] }
 0x29f   : > { %806 = vrot.lane.b32.xlu1 %v3614_v11, %s3053_s14  ;;  %791 = vrot.lane.b32.xlu0 %v3614_v11, %s3054_s25  ;;  %s688_s25 = scalar_lea.vmem [#allocation29], %s2089_s20  ;;  %s3065_s20 = smov [#allocation29]  }
 0x2a1   : > { %s2128_s14 = sshll.u32 %s3841_s30, 7 }
 0x2a2   : > { %v832_v20 = vld [vmem:[#allocation2] sm:$0xff] }
 0x2a3   : > { %801 = vrot.lane.b32.xlu1 %v3614_v11, %s3055_s21  ;;  %821 = vrot.lane.b32.xlu0 %v3614_v11, %s3056_s6  ;;  %s1856_s21 = sshll.u32 %s688_s25, 4  ;;  %s3711_s21 = int_to_ptr.vmem [resolvable:$true] %s1856_s21 }
 0x2a7   : > { %816 = vrot.lane.b32.xlu0 %v3614_v11, %s3057_s3 }
 0x30d   : > { %v787_v13 = vpop.permute.xlu1 %786  ;;  %v779_v14 = vpop.permute.xlu0 %778 }
 0x30e   : > { %790 = vst.msk [vmem:[#allocation2 + $0x8] sm:$0xff] %vm775_vm2, %v787_v13  ;;  %781 = vst.msk [vmem:[#allocation3] sm:$0xff] %vm775_vm2, %v779_v14 }
 0x311   : > { %v807_v15 = vpop.permute.xlu1 %806  ;;  %v792_v16 = vpop.permute.xlu0 %791 }
 0x312   : > { %810 = vst.msk [vmem:[#allocation3 + $0x10] sm:$0xff] %vm775_vm2, %v807_v15  ;;  %795 = vst.msk [vmem:[#allocation3 + $0x8] sm:$0xff] %vm775_vm2, %v792_v16 }
 0x315   : > { %v802_v17 = vpop.permute.xlu1 %801  ;;  %v822_v18 = vpop.permute.xlu0 %821  ;;  %v839_v19 = vld [vmem:[#allocation3] sm:$0xff]  ;;  %v833_v24 = vld [vmem:[#allocation2 + $0x8] sm:$0xff] }
 0x316   : > { %805 = vst.msk [vmem:[#allocation2 + $0x10] sm:$0xff] %vm775_vm2, %v802_v17  ;;  %825 = vst.msk [vmem:[#allocation3 + $0x18] sm:$0xff] %vm775_vm2, %v822_v18  ;;  %2183 = vmatpush3.xpose.msk.msra.mxu1 %vm775_vm2, %v839_v19 }
 0x317   : > { %2187 = vmatprep.subr.mxu1 %v3050_v1 }
 0x319   : > { %v817_v21 = vpop.permute.xlu0 %816  ;;  %2185 = vmatmul.mubr.msk.f32.vlgmr.msra.gmra.mrb[2].mxu1 %vm775_vm2, %v832_v20  ;;  %v840_v22 = vld [vmem:[#allocation3 + $0x8] sm:$0xff]  ;;  %v841_v23 = vld [vmem:[#allocation3 + $0x10] sm:$0xff] }
 0x31a   : > { %820 = vst.msk [vmem:[#allocation2 + $0x18] sm:$0xff] %vm775_vm2, %v817_v21  ;;  %2188 = vmatpush3.xpose.msk.msra.mxu1 %vm775_vm2, %v840_v22  ;;  %2193 = vmatpush3.xpose.msk.msra.mxu0 %vm775_vm2, %v841_v23 }
 0x31b   : > { %2189 = vmatprep.mubr.msk.f32.mxu1 %vm3049_vm0, %v3050_v1  ;;  %2197 = vmatprep.subr.mxu1 %v3050_v1 }
 0x31c   : > { %2202 = vmatprep.subr.mxu0 %v3050_v1 }
 0x31d   : > { %2190 = vmatmul.mubr.msk.f32.vlgmr.msra.gmra.mrb[4].mxu1 %vm775_vm2, %v833_v24  ;;  %v834_v25 = vld [vmem:[#allocation2 + $0x10] sm:$0xff]  ;;  %v842_v26 = vld [vmem:[#allocation3 + $0x18] sm:$0xff] }
 0x31e   : > { %2195 = vmatmul.mubr.msk.f32.vlgmr.msra.gmra.mrb[0].mxu0 %vm775_vm2, %v834_v25  ;;  %2198 = vmatpush3.xpose.msk.msra.mxu1 %vm775_vm2, %v842_v26 }
 0x31f   : > { %2199 = vmatprep.mubr.msk.f32.mxu1 %vm3049_vm0, %v3050_v1  ;;  %2207 = vmatprep.subr.mxu1 %v3050_v1 }
 0x320   : > { %2204 = vmatprep.mubr.msk.f32.mxu0 %vm3049_vm0, %v3050_v1 }
 0x321   : > { %v835_v27 = vld [vmem:[#allocation2 + $0x18] sm:$0xff] }
 0x322   : > { %2200 = vmatmul.mubr.msk.f32.vlgmr.msra.gmra.mrb[6].mxu1 %vm775_vm2, %v835_v27 }
 0x323   : > { %2209 = vmatprep.mubr.msk.f32.mxu1 %vm3049_vm0, %v3050_v1 }
 0x3ec   : > { %v915_v34 = vpop.f32.mrb[2].mxu1 }
 0x3ed   : > { %v1147_v35 = vmul.f32 0.35355338, %v915_v34  ;;  %v2186_v36 = vpop.f32.mrb[3].mxu1  ;;  %v1522_v34 = vld [vmem:[#allocation14 + $0x8] sm:$0xff] }
 0x3ee   : > { %v1523_v36 = vld [vmem:[#allocation14 + $0x10] sm:$0xff] }
 0x3ef   : > { %v1157_v37 = vadd.f32 %v1155_v33, %v1147_v35 }
 0x3f0   : > { %v991_v38 = vpop.f32.mrb[4].mxu1 }
 0x3f1   : > { %v1148_v39 = vmul.f32 0.35355338, %v991_v38  ;;  %v2191_v40 = vpop.f32.mrb[5].mxu1  ;;  %v1067_v41 = vpop.f32.mrb[0].mxu0  ;;  %v1161_v42 = vsel %vm775_vm2, %v1157_v37, -inf }
 0x3f2   : > { %v1149_v43 = vmul.f32 0.35355338, %v1067_v41  ;;  %v2196_v44 = vpop.f32.mrb[1].mxu0  ;;  %1162 = vmax.xlane.f32.xlu1 %v1161_v42 }
 0x3f3   : > { %v1158_v45 = vadd.f32 %v1155_v33, %v1148_v39 }
 0x3f4   : > { %v1159_v48 = vadd.f32 %v1155_v33, %v1149_v43 }
 0x3f5   : > { %v1143_v46 = vpop.f32.mrb[6].mxu1  ;;  %v1164_v47 = vsel %vm775_vm2, %v1158_v45, -inf }
 0x3f6   : > { %v1150_v49 = vmul.f32 0.35355338, %v1143_v46  ;;  %1165 = vmax.xlane.f32.xlu0 %v1164_v47  ;;  %v2201_v50 = vpop.f32.mrb[7].mxu1  ;;  %v1167_v52 = vsel %vm775_vm2, %v1159_v48, -inf }
 0x3f8   : > { %v1160_v51 = vadd.f32 %v1155_v33, %v1150_v49  ;;  %v1521_v33 = vld [vmem:[#allocation14] sm:$0xff] }
 0x3f9   : > { %v2270_v35 = vpack.c.bf16 %v1522_v34, %v1521_v33 }
 0x3fa   : > { %1168 = vmax.xlane.f32.xlu0 %v1167_v52  ;;  %v1170_v53 = vsel %vm775_vm2, %v1160_v51, -inf }
 0x3fb   : > { %1171 = vmax.xlane.f32.xlu1 %v1170_v53 }
 0x40c   : > { %796 = vrot.lane.b32.xlu1 %v3614_v11, %s3058_s19  ;;  %s3842_s19 = sld [smem:[#allocation52_spill]] }
 0x410   : > { %782 = vrot.lane.b32.xlu0 %v3614_v11, %s3059_s24 }
 0x412   : > { %s3709_s24 = scalar_lea.hbm %s3842_s19, %s2128_s14 }
 0x47f   : > { %v1163_v54 = vpop.xlane.xlu1 %1162 }
 0x480   : > { %v1173_v55 = vsub.f32 %v1157_v37, %v1163_v54  ;;  %v1524_v37 = vld [vmem:[#allocation14 + $0x18] sm:$0xff] }
 0x481   : > { %v2273_v38 = vpack.c.bf16 %v1524_v37, %v1523_v36 }
 0x482   : > { %v1177_v56 = vmul.f32 1.442695, %v1173_v55 }
 0x483   : > { %v1166_v57 = vpop.xlane.xlu0 %1165 }
 0x484   : > { %2500 = vpow2.f32 %v1177_v56  ;;  %v1174_v58 = vsub.f32 %v1158_v45, %v1166_v57 }
 0x486   : > { %v1179_v59 = vmul.f32 1.442695, %v1174_v58 }
 0x487   : > { %v1169_v60 = vpop.xlane.xlu0 %1168 }
 0x488   : > { %2502 = vpow2.f32 %v1179_v59  ;;  %v1175_v61 = vsub.f32 %v1159_v48, %v1169_v60  ;;  %v1172_v62 = vpop.xlane.xlu1 %1171 }
 0x489   : > { %v1176_v63 = vsub.f32 %v1160_v51, %v1172_v62  ;;  %v2117_v51 = vld [vmem:[#allocation15] ss:$0 sm:$0xff]  ;;  %v1636_v62 = vld [vmem:[#allocation17] sm:$0xff] }
 0x48a   : > { %v1181_v2 = vmul.f32 1.442695, %v1175_v61 }
 0x48b   : > { %v1183_v3 = vmul.f32 1.442695, %v1176_v63  ;;  %v783_v4 = vpop.permute.xlu0 %782  ;;  %v1637_v63 = vld [vmem:[#allocation17 + $0x8] sm:$0xff] }
 0x48c   : > { %2504 = vpow2.f32 %v1181_v2  ;;  %785 = vst.msk [vmem:[#allocation4] sm:$0xff] %vm775_vm2, %v783_v4  ;;  %v797_v5 = vpop.permute.xlu1 %796  ;;  %v2276_v2 = vpack.c.bf16 %v1637_v63, %v1636_v62 }
 0x48d   : > { %2506 = vpow2.f32 %v1183_v3  ;;  %800 = vst.msk [vmem:[#allocation4 + $0x8] sm:$0xff] %vm775_vm2, %v797_v5  ;;  %v1639_v3 = vld [vmem:[#allocation17 + $0x18] sm:$0xff]  ;;  %v1722_v5 = vld [vmem:[#allocation20 + $0x8] sm:$0xff] }
 0x48e   : > { %v2501_v6 = vpop.eup %2500 }
 0x48f   : > { %v1185_v7 = vsel %vm775_vm2, %v2501_v6, 0.0 }
 0x490   : > { %1186 = vadd.xlane.f32.xlu0 %v1185_v7 }
 0x492   : > { %v2503_v9 = vpop.eup %2502 }
 0x493   : > { %v1205_v10 = vld [vmem:[#allocation4] sm:$0xff]  ;;  %v1188_v12 = vsel %vm775_vm2, %v2503_v9, 0.0 }
 0x494   : > { %2203 = vmatpush3.msra.mxu0 %v1205_v10  ;;  %1189 = vadd.xlane.f32.xlu1 %v1188_v12  ;;  %v1206_v13 = vld [vmem:[#allocation4 + $0x8] sm:$0xff]  ;;  %v1725_v12 = vld [vmem:[#allocation20 + $0x20] sm:$0xff] }
 0x495   : > { %2208 = vmatpush3.msra.mxu1 %v1206_v13  ;;  %2212 = vmatprep.subr.mxu0 %v3050_v1  ;;  %v1726_v13 = vld [vmem:[#allocation20 + $0x28] sm:$0xff] }
 0x496   : > { %v2505_v14 = vpop.eup %2504  ;;  %2217 = vmatprep.subr.mxu1 %v3050_v1 }
 0x497   : > { %v2507_v15 = vpop.eup %2506  ;;  %v1191_v16 = vsel %vm775_vm2, %v2505_v14, 0.0 }
 0x498   : > { %1192 = vadd.xlane.f32.xlu0 %v1191_v16  ;;  %v1194_v17 = vsel %vm775_vm2, %v2507_v15, 0.0 }
 0x499   : > { %1195 = vadd.xlane.f32.xlu1 %v1194_v17 }
 0x4aa   : > { %811 = vrot.lane.b32.xlu1 %v3614_v11, %s3060_s4  ;;  %s1842_s4 = scalar_lea.sflag [#allocation8], %s3553_s1 }
 0x4ae   : > { %826 = vrot.lane.b32.xlu0 %v3614_v11, %s3061_s5  ;;  %s2916_s5 = scalar_lea.vmem %s3711_s21, 128 }
 0x4af   : > { %p2917_p10 = scmp.ne.s32.totalorder %s3711_s21, %s2916_s5 }
 0x4b1   : > { %p2918_p5 = pnand %p2917_p10, %p3843_p1 }
 0x4b3   : > { %p2919_p8 = pneg %p2918_p5 }
 0x51d   : > { %v1187_v18 = vpop.xlane.xlu0 %1186 }
 0x51e   : > { %2508 = vrcp.f32 %v1187_v18 }
 0x521   : > { %v1190_v19 = vpop.xlane.xlu1 %1189 }
 0x522   : > { %2510 = vrcp.f32 %v1190_v19  ;;  %v2119_v19 = vld [vmem:[#allocation23] ss:$0 sm:$0xff] }
 0x525   : > { %v1193_v20 = vpop.xlane.xlu0 %1192 }
 0x526   : > { %2512 = vrcp.f32 %v1193_v20  ;;  %v1196_v21 = vpop.xlane.xlu1 %1195 }
 0x527   : > { %2514 = vrcp.f32 %v1196_v21  ;;  %v2120_v21 = vld [vmem:[#allocation24] ss:$0 sm:$0xff] }
 0x528   : > { %v2509_v22 = vpop.eup %2508 }
 0x529   : > { %v1201_v23 = vmul.f32 %v2509_v22, %v2501_v6  ;;  %v827_v24 = vpop.permute.xlu0 %826  ;;  %v1723_v6 = vld [vmem:[#allocation20 + $0x10] sm:$0xff] }
 0x52a   : > { %830 = vst.msk [vmem:[#allocation4 + $0x18] sm:$0xff] %vm775_vm2, %v827_v24  ;;  %v812_v25 = vpop.permute.xlu1 %811  ;;  %v1727_v24 = vld [vmem:[#allocation20 + $0x30] sm:$0xff] }
 0x52b   : > { %815 = vst.msk [vmem:[#allocation4 + $0x10] sm:$0xff] %vm775_vm2, %v812_v25  ;;  %2205 = vmatmul.mubr.msk.f32.vlgmr.msra.gmra.mrb[2].mxu0 %vm775_vm2, %v1201_v23  ;;  %v1728_v25 = vld [vmem:[#allocation20 + $0x38] sm:$0xff] }
 0x52c   : > { %v2511_v26 = vpop.eup %2510  ;;  %2214 = vmatprep.mubr.msk.f32.mxu0 %vm3049_vm0, %v3050_v1 }
 0x52d   : > { %v1202_v11 = vmul.f32 %v2511_v26, %v2503_v9  ;;  %v1724_v9 = vld [vmem:[#allocation20 + $0x18] sm:$0xff]  ;;  %v2291_v26 = vpack.c.bf16 %v1728_v25, %v1727_v24 }
 0x52e   : > { %v2285_v10 = vpack.c.bf16 %v1724_v9, %v1723_v6 }
 0x52f   : > { %2210 = vmatmul.mubr.msk.f32.vlgmr.msra.gmra.mrb[8].mxu1 %vm775_vm2, %v1202_v11  ;;  %v2121_v11 = vld [vmem:[#allocation18] ss:$0 sm:$0xff] }
 0x530   : > { %v2513_v27 = vpop.eup %2512  ;;  %2219 = vmatprep.mubr.msk.f32.mxu1 %vm3049_vm0, %v3050_v1 }
 0x531   : > { %v2515_v28 = vpop.eup %2514  ;;  %v1203_v29 = vmul.f32 %v2513_v27, %v2505_v14  ;;  %v1208_v30 = vld [vmem:[#allocation4 + $0x18] sm:$0xff]  ;;  %v2288_v14 = vpack.c.bf16 %v1726_v13, %v1725_v12 }
 0x532   : > { %v1204_v31 = vmul.f32 %v2515_v28, %v2507_v15  ;;  %2218 = vmatpush3.msra.mxu1 %v1208_v30  ;;  %v1207_v32 = vld [vmem:[#allocation4 + $0x10] sm:$0xff]  ;;  %v2123_v30 = vld [vmem:[#allocation21] ss:$0 sm:$0xff] }
 0x533   : > { %2213 = vmatpush3.msra.mxu0 %v1207_v32  ;;  %2275 = vmatprep.subr.bf16.mxu1 %v3048_v0 }
 0x534   : > { %2215 = vmatmul.mubr.msk.f32.vlgmr.msra.gmra.mrb[4].mxu0 %vm775_vm2, %v1203_v29  ;;  %2220 = vmatmul.mubr.msk.f32.vlgmr.msra.gmra.mrb[10].mxu1 %vm775_vm2, %v1204_v31 }
 0x535   : > { %2269 = vmatprep.subr.bf16.mxu0 %v3048_v0  ;;  %2230 = vmatprep.mubr.msk.f32.mxu0 %vm3049_vm0, %v3050_v1 }
 0x536   : > { %2241 = vmatprep.mubr.msk.f32.mxu1 %vm3049_vm0, %v3050_v1  ;;  %2271 = vmatpush3.bf16.msra.mxu0 %v2270_v35 }
 0x537   : > { %2272 = vmatprep.subr.bf16.mxu0 %v3048_v0  ;;  %2277 = vmatpush3.bf16.msra.mxu1 %v2276_v2 }
 0x538   : > { %2278 = vmatprep.subr.bf16.mxu1 %v3048_v0 }
 0x53a   : > { %2274 = vmatpush3.bf16.msra.mxu0 %v2273_v38 }
 0x53b   : > { %2281 = vmatprep.subr.bf16.mxu0 %v3048_v0 }
 0x5fe   : > { %v1278_v39 = vpop.f32.mrb[2].mxu0 }
 0x5ff   : > { %1501 = vst.msk [vmem:[#allocation5] sm:$0xff] %vm775_vm2, %v1278_v39  ;;  %v2206_v40 = vpop.f32.mrb[3].mxu0 }
 0x602   : > { %v1351_v41 = vpop.f32.mrb[8].mxu1 }
 0x603   : > { %1503 = vrot.lane.b32.xlu1 %v1351_v41, %s3062_s23  ;;  %v2211_v42 = vpop.f32.mrb[9].mxu1  ;;  %s2920_s23 = sshll.u32 %s3065_s20, 4  ;;  %s2921_s23 = int_to_ptr.vmem [resolvable:$false] %s2920_s23 }
 0x604   : > { %p2923_p3 = scmp.lt.s32.totalorder %s3711_s21, %s2921_s23 }
 0x607   : > { %v1424_v43 = vpop.f32.mrb[4].mxu0  ;;  %v1497_v44 = vpop.f32.mrb[10].mxu1 }
 0x608   : > { %1509 = vrot.lane.b32.xlu0 %v1424_v43, %s3063_s2  ;;  %v2216_v45 = vpop.f32.mrb[5].mxu0  ;;  %1515 = vrot.lane.b32.xlu1 %v1497_v44, %s3064_s26  ;;  %v2221_v46 = vpop.f32.mrb[11].mxu1  ;;  %s2922_s2 = scalar_lea.vmem %s2921_s23, 256 }
 0x609   : > { %v2125_v45 = vld [vmem:[#allocation26] ss:$0 sm:$0xff]  ;;  %p2924_p11 = scmp.lt.s32.totalorder %s2922_s2, %s2916_s5 }
 0x60b   : > { %p2925_p6 = por %p2924_p11, %p2923_p3 }
 0x60d   : > { %p2926_p13 = pnand %p2925_p6, %p2919_p8 }
 0x675   : > { %v1504_v47 = vpop.permute.xlu1 %1503 }
 0x676   : > { %1507 = vst.msk [vmem:[#allocation5] sm:$0xff] %vm1506_vm4, %v1504_v47  ;;  %v2126_v47 = vld [vmem:[#allocation27] ss:$0 sm:$0xff] }
 0x67a   : > { %v1510_v48 = vpop.permute.xlu0 %1509  ;;  %v1516_v49 = vpop.permute.xlu1 %1515 }
 0x67b   : > { %1513 = vst.msk [vmem:[#allocation5] sm:$0xff] %vm1512_vm5, %v1510_v48 }
 0x67c   : > { %1519 = vst.msk [vmem:[#allocation5] sm:$0xff] %vm1518_vm6, %v1516_v49 }
 0x683   : > { %v1520_v50 = vld [vmem:[#allocation5] sm:$0xff] }
 0x684   : > { %2231 = vmatmul.mubr.msk.f32.vlgmr.msra.gmra.mrb[6].mxu0 %vm701_vm1, %v1520_v50 }
 0x685   : > { %2260 = vmatprep.mubr.msk.f32.mxu0 %vm3049_vm0, %v3050_v1  ;;  %v1638_v1 = vld [vmem:[#allocation17 + $0x10] sm:$0xff] }
 0x686   : > { %v2279_v4 = vpack.c.bf16 %v1639_v3, %v1638_v1 }
 0x688   : > { %2280 = vmatpush3.bf16.msra.mxu1 %v2279_v4 }
 0x757   : > { %v1601_v52 = vpop.f32.mrb[6].mxu0 }
 0x758   : > { %v1602_v53 = vadd.f32 %v2117_v51, %v1601_v52  ;;  %v2232_v54 = vpop.f32.mrb[7].mxu0 }
 0x75a   : > { %v1605_v55 = vadd.f32 %v1602_v53, %v3607_v8  ;;  %v1721_v8 = vld [vmem:[#allocation20] sm:$0xff] }
 0x75b   : > { %v2282_v7 = vpack.c.bf16 %v1722_v5, %v1721_v8 }
 0x75c   : > { %v1608_v56 = vsel %vm701_vm1, %v1605_v55, 0.0 }
 0x75d   : > { %1609 = vadd.xlane.f32.xlu0 %v1608_v56  ;;  %2283 = vmatpush3.bf16.msra.mxu0 %v2282_v7 }
 0x75e   : > { %2284 = vmatprep.subr.bf16.mxu0 %v3048_v0 }
 0x761   : > { %2286 = vmatpush3.bf16.msra.mxu0 %v2285_v10 }
 0x762   : > { %2287 = vmatprep.subr.bf16.mxu0 %v3048_v0 }
 0x765   : > { %2289 = vmatpush3.bf16.msra.mxu0 %v2288_v14 }
 0x766   : > { %2290 = vmatprep.subr.bf16.mxu0 %v3048_v0 }
 0x769   : > { %2292 = vmatpush3.bf16.msra.mxu0 %v2291_v26 }
 0x7ea   : > { %v1610_v57 = vpop.xlane.xlu0 %1609 }
 0x7eb   : > { %v1612_v58 = vmul.f32 0.03125, %v1610_v57 }
 0x7ed   : > { %v1613_v59 = vsub.f32 %v1605_v55, %v1612_v58 }
 0x7ef   : > { %v1614_v60 = vmul.f32 %v1613_v59, %v1613_v59 }
 0x7f1   : > { %v1615_v61 = vsel %vm701_vm1, %v1614_v60, 0.0 }
 0x7f2   : > { %1616 = vadd.xlane.f32.xlu1 %v1615_v61 }
 0x87f   : > { %v1617_v15 = vpop.xlane.xlu1 %1616 }
 0x880   : > { %v1618_v16 = vmul.f32 0.03125, %v1617_v15 }
 0x882   : > { %v1619_v17 = vadd.f32 1e-05, %v1618_v16 }
 0x884   : > { %2516 = vrsqrt.f32 %v1619_v17 }
 0x88e   : > { %v2517_v18 = vpop.eup %2516 }
 0x88f   : > { %v1621_v20 = vmul.f32 %v2517_v18, %v1613_v59 }
 0x891   : > { %v1628_v22 = vmul.f32 %v2119_v19, %v1621_v20 }
 0x893   : > { %v1635_v23 = vadd.f32 %v2120_v21, %v1628_v22 }
 0x895   : > { %2242 = vmatmul.mubr.msk.f32.vlgmr.msra.gmra.mrb[12].mxu1 %vm701_vm1, %v1635_v23 }
 0x968   : > { %v1716_v27 = vpop.f32.mrb[12].mxu1 }
 0x969   : > { %v1717_v28 = vadd.f32 %v2121_v11, %v1716_v27  ;;  %v2243_v0 = vpop.f32.mrb[13].mxu1 }
 0x96b   : > { %v1720_v29 = vmax.f32 %v1717_v28, 0.0 }
 0x96d   : > { %2261 = vmatmul.mubr.msk.f32.vlgmr.msra.gmra.mrb[8].mxu0 %vm1736_vm7, %v1720_v29 }
 0xa40   : > { %v1806_v31 = vpop.f32.mrb[8].mxu0 }
 0xa41   : > { %v1807_v32 = vadd.f32 %v2123_v30, %v1806_v31  ;;  %v2262_v33 = vpop.f32.mrb[9].mxu0 }
 0xa43   : > { %v1810_v34 = vadd.f32 %v1807_v32, %v1635_v23 }
 0xa45   : > { %v1813_v35 = vsel %vm701_vm1, %v1810_v34, 0.0 }
 0xa46   : > { %1814 = vadd.xlane.f32.xlu0 %v1813_v35 }
 0xad3   : > { %v1815_v36 = vpop.xlane.xlu0 %1814 }
 0xad4   : > { %v1816_v37 = vmul.f32 0.03125, %v1815_v36 }
 0xad6   : > { %v1817_v38 = vsub.f32 %v1810_v34, %v1816_v37 }
 0xad8   : > { %v1818_v39 = vmul.f32 %v1817_v38, %v1817_v38 }
 0xada   : > { %v1819_v40 = vsel %vm701_vm1, %v1818_v39, 0.0 }
 0xadb   : > { %1820 = vadd.xlane.f32.xlu0 %v1819_v40 }
 0xb68   : > { %v1821_v41 = vpop.xlane.xlu0 %1820 }
 0xb69   : > { %v1822_v42 = vmul.f32 0.03125, %v1821_v41 }
 0xb6b   : > { %v1823_v43 = vadd.f32 1e-05, %v1822_v42 }
 0xb6d   : > { %2518 = vrsqrt.f32 %v1823_v43 }
 0xb77   : > { %v2519_v44 = vpop.eup %2518 }
 0xb78   : > { %v1825_v46 = vmul.f32 %v2519_v44, %v1817_v38 }
 0xb7a   : > { %v1832_v48 = vmul.f32 %v2125_v45, %v1825_v46 }
 0xb7c   : > { %v1839_v49 = vadd.f32 %v2126_v47, %v1832_v48 }
 0xb7e   : > { %1840 = vst.msk [vmem:[%s688_s25] sm:$0xff] %vm701_vm1, %v1839_v49 }
 0xb7f   : > { %2929 = shalt.err (!%p2926_p13)
}
 0xb80   : > { %s2930_s1 = scalar_lea.hbm %s3709_s24, 128  ;;  %s2934_s14 = scalar_lea.hbm %s3842_s19, 256 }
 0xb81   : > { %p2931_p4 = scmp.ne.s32.totalorder %s3709_s24, %s2930_s1  ;;  %p2935_p7 = scmp.lt.u32.totalorder %s3709_s24, %s3842_s19 }
 0xb82   : > { %p2936_p12 = scmp.lt.u32.totalorder %s2934_s14, %s2930_s1  ;;  %p2938_p10 = scmp.lt.u32.totalorder %s2930_s1, %s3709_s24 }
 0xb83   : > { %p2932_p9 = pnand %p2931_p4, %p3843_p1 }
 0xb84   : > { %p2937_p2 = por %p2936_p12, %p2935_p7 }
 0xb85   : > { %p2933_p0 = pneg %p2932_p9 }
 0xb86   : > { %p2939_p5 = por %p2938_p10, %p2937_p2 }
 0xb88   : > { %p2940_p8 = pnand %p2939_p5, %p2933_p0 }
 0xb8a   : > { %2943 = shalt.err (!%p2940_p8)
}
 0xb8b   : > { %2345 = dma.vmem_to_hbm [thread:$0]  (%p3843_p1), %s3711_s21, 128, %s3709_s24, %s1842_s4  }
 0xb8c PF: > { %s3844_s3 = sld [smem:[#allocation40_spill]]  ;;  %p3845_p3 = scmp.ne.s32.totalorder %s3817_s28, 0 }
 0xb8d   : > { %p3846_p11 = scmp.ge.s32.totalorder %s3030_s18, 2 }
 0xb8f   : > { %p2392_p6 = pnand %p3846_p11, %p3845_p3 }
 0xb92   : > { %s1868_s5 = sand.u32 1, %s3844_s3  }
 0xb93   : > { %s1869_s20 = scalar_lea.sflag [#allocation8], %s1868_s5 }
 0xb94   : > { %3005 = dma.done.wait (!%p2392_p6), %s1869_s20, 128  }
 0xb95   : > { %3007 = vsyncadd (!%p2392_p6), %s1869_s20, 4294967168  ;;  %s39_s18 = sadd.s32 1, %s3030_s18   ;;  %s3847_s29 = sld [smem:[#allocation41_spill]] }
 0xb96   : > { %p36_p13 = scmp.ge.s32.totalorder %s39_s18, 4   ;;  %s3848_s23 = smov %s3854_s16 }
 0xb97   : > { %s3849_s30 = smov %s3018_s15  ;;  %s3850_s15 = smov %s3470_s27 }
 0xb98   : > { %s3851_s16 = smov %s3026_s17  ;;  %s3852_s17 = smov %s3848_s23 }
 0xb99   :  { %38 = sbr.rel (!%p36_p13) target bundleno = 23 (0x17), region = 191 }
 0xba0   :  { %1874 = vsyncpa [#allocation7], 1 }
 0xba1   :  { %1876 = vsyncpa [#allocation7 + $0x1], 1 }
 0xba2   :  { %1877 = vsyncpa [#allocation10], 1 }
 0xba3   :  { %1879 = vsyncpa [#allocation10 + $0x1], 1 }
 0xba4   :  { %1880 = vsyncpa [#allocation13], 1 }
 0xba5   :  { %1881 = vsyncpa [#allocation16], 1 }
 0xba6   :  { %1882 = vsyncpa [#allocation19], 1 }
 0xba7   :  { %1883 = vsyncpa [#allocation22], 1 }
 0xba8   :  { %1884 = vsyncpa [#allocation25], 1 }
 0xba9   :  { %1885 = vsyncpa [#allocation28], 1 }
 0xbaa   :  { %1886 = vsyncpa [#allocation8], 1 }
 0xbab   :  { %1888 = vsyncpa [#allocation8 + $0x1], 1 }

</bundles_post_ra>
